<compile_context>
chip_gen: v5e
topology: v5e:2x2
jax: 0.10.0
libtpu: 0.0.40
codegen_flags: <defaults>
</compile_context>

<pallas_src>
import jax
import jax.numpy as jnp
from jax.experimental import pallas as pl
from jax.experimental.pallas import tpu as pltpu

EPS = 1e-5  # PyTorch BatchNorm2d default eps


# ----------------------------- Pallas kernels ------------------------------ #

def conv_phase_kernel(x_ref, w_ref, y_ref, s_ref):
    """Phase-packed 3x3-on-upsampled-grid conv, computed at original resolution.

    x_ref: (1, H+2, W+2, Cin)  zero-padded original-resolution image (NHWC)
    w_ref: (9*Cin, Ctile)      tap-major im2col weights; 4 output phases packed
                               into the lane-padded channel dim
    y_ref: (1, H*W, Ctile)     phase-packed conv output (lane dense)
    s_ref: (1, 2, Ctile)       per-image [sum; sum_of_squares] per packed column
    """
    _, Hp, Wp, Cin = x_ref.shape
    H, W = Hp - 2, Wp - 2

    xb = x_ref[0]  # load the padded tile once: (H+2, W+2, Cin)
    taps = []
    for dy in range(3):
        for dx in range(3):
            taps.append(xb[dy:dy + H, dx:dx + W, :].reshape(H * W, Cin))
    # Single im2col matmul on the MXU: (H*W, 9*Cin) x (9*Cin, Ctile)
    patches = jnp.concatenate(taps, axis=-1).astype(w_ref.dtype)
    acc = jnp.dot(patches, w_ref[...], preferred_element_type=jnp.float32)

    y_ref[...] = acc[None].astype(y_ref.dtype)

    # Fused BatchNorm partial statistics (global reduction finished by wrapper).
    ssum = jnp.sum(acc, axis=0, keepdims=True)
    ssq = jnp.sum(acc * acc, axis=0, keepdims=True)
    s_ref[...] = jnp.concatenate([ssum, ssq], axis=0)[None]


def bn_relu_kernel(y_ref, scale_ref, shift_ref, o_ref):
    """Fused folded-BatchNorm (scale*x + shift) + ReLU epilogue."""
    y = y_ref[...]                                    # (1, H*W, Ctile)
    o_ref[...] = jnp.maximum(y * scale_ref[...] + shift_ref[...], 0.0)


# ------------------------------- wrapper ----------------------------------- #

def _fold_phase_weights(w_oihw, ctile):
    """Fold 3x3 conv weights for the nearest-x2 sub-pixel decomposition.

    Returns (9*Cin, ctile): rows are tap-major (tap = dy*3+dx on the ORIGINAL
    grid, offsets dy,dx in {0,1,2} relative to the padded input), columns are
    (phase a*2+b)*Cout + cout, zero-padded to `ctile` lanes.
    """
    cout, cin = w_oihw.shape[0], w_oihw.shape[1]
    # upsampled-grid kernel index k in {0,1,2}, output phase a in {0,1}
    #   -> original-grid tap offset d in {0,1,2}:  d = floor((a+k-1)/2) + 1
    dmap = lambda a, k: (a + k + 1) // 2
    wb = jnp.zeros((9, cin, 4, cout), jnp.float32)
    for a in range(2):
        for b in range(2):
            for ky in range(3):
                for kx in range(3):
                    t = dmap(a, ky) * 3 + dmap(b, kx)
                    wb = wb.at[t, :, a * 2 + b, :].add(w_oihw[:, :, ky, kx].T)
    wbig = jnp.zeros((9 * cin, ctile), jnp.float32)
    return wbig.at[:, :4 * cout].set(wb.reshape(9 * cin, 4 * cout))


def up_conv_forward(x_nchw, w_oihw, bias, gamma, beta, *, use_bf16=False):
    """Forward of up_conv: Upsample(x2, nearest) -> Conv2d(3x3, pad=1) -> BN(train) -> ReLU.

    `bias` is accepted for API parity but unused: training-mode BatchNorm mean
    subtraction cancels a per-channel conv bias exactly.
    """
    del bias
    N, Cin, H, W = x_nchw.shape
    Cout = w_oihw.shape[0]
    Ho, Wo = 2 * H, 2 * W
    Ctile = ((4 * Cout + 127) // 128) * 128        # lane-dense packed channel dim
    compute_dtype = jnp.bfloat16 if use_bf16 else jnp.float32

    # NCHW -> NHWC + pad=1, at ORIGINAL resolution (no upsampled tensor in HBM).
    x_nhwc = jnp.transpose(x_nchw, (0, 2, 3, 1)).astype(compute_dtype)
    x_pad = jnp.pad(x_nhwc, ((0, 0), (1, 1), (1, 1), (0, 0)))

    wbig = _fold_phase_weights(w_oihw.astype(jnp.float32), Ctile).astype(compute_dtype)

    # ---- pass 1: phase-packed conv + per-tile BN partial sums ----
    y1, stats = pl.pallas_call(
        conv_phase_kernel,
        out_shape=(jax.ShapeDtypeStruct((N, H * W, Ctile), jnp.float32),
                   jax.ShapeDtypeStruct((N, 2, Ctile), jnp.float32)),
        grid=(N,),
        in_specs=[
            pl.BlockSpec((1, H + 2, W + 2, Cin), lambda n: (n, 0, 0, 0)),
            pl.BlockSpec((9 * Cin, Ctile), lambda n: (0, 0)),
        ],
        out_specs=(
            pl.BlockSpec((1, H * W, Ctile), lambda n: (n, 0, 0)),
            pl.BlockSpec((1, 2, Ctile), lambda n: (n, 0, 0)),
        ),
        compiler_params=pltpu.CompilerParams(dimension_semantics=("parallel",)),
    )(x_pad, wbig)

    # ---- global BN stats, folded into a single per-channel scale/shift ----
    count = float(N * Ho * Wo)
    s = jnp.sum(stats, axis=0)[:, :4 * Cout]       # (2, 4*Cout)
    s = s.reshape(2, 4, Cout).sum(axis=1)          # reduce the 4 output phases
    mean = s[0] / count
    var = jnp.maximum(s[1] / count - mean * mean, 0.0)
    scale = gamma.astype(jnp.float32) * jax.lax.rsqrt(var + EPS)
    shift = beta.astype(jnp.float32) - mean * scale
    scale_p = jnp.zeros((1, Ctile), jnp.float32).at[0, :4 * Cout].set(jnp.tile(scale, 4))
    shift_p = jnp.zeros((1, Ctile), jnp.float32).at[0, :4 * Cout].set(jnp.tile(shift, 4))

    # ---- pass 2: fused scale/shift + ReLU epilogue ----
    out_packed = pl.pallas_call(
        bn_relu_kernel,
        out_shape=jax.ShapeDtypeStruct((N, H * W, Ctile), jnp.float32),
        grid=(N,),
        in_specs=[
            pl.BlockSpec((1, H * W, Ctile), lambda n: (n, 0, 0)),
            pl.BlockSpec((1, Ctile), lambda n: (0, 0)),
            pl.BlockSpec((1, Ctile), lambda n: (0, 0)),
        ],
        out_specs=pl.BlockSpec((1, H * W, Ctile), lambda n: (n, 0, 0)),
        compiler_params=pltpu.CompilerParams(dimension_semantics=("parallel",)),
    )(y1, scale_p, shift_p)

    # ---- un-pack the 4 phases (pixel shuffle) and return NCHW ----
    p = out_packed[:, :, :4 * Cout].reshape(N, H, W, 2, 2, Cout)  # (n,i,j,a,b,c)
    return p.transpose(0, 5, 1, 3, 2, 4).reshape(N, Cout, Ho, Wo)


# ------------------------------ reference ----------------------------------- #

def reference(x, w, b, gamma, beta):
    """Pure-JAX reference of the PyTorch forward (training-mode BN)."""
    xu = jnp.repeat(jnp.repeat(x, 2, axis=2), 2, axis=3)
    y = jax.lax.conv_general_dilated(
        xu, w, (1, 1), "SAME",
        dimension_numbers=("NCHW", "OIHW", "NCHW")) + b[None, :, None, None]
    mean = y.mean(axis=(0, 2, 3), keepdims=True)
    var = ((y - mean) ** 2).mean(axis=(0, 2, 3), keepdims=True)
    yn = (gamma[None, :, None, None] * (y - mean) * jax.lax.rsqrt(var + EPS)
          + beta[None, :, None, None])
    return jnp.maximum(yn, 0.0)


if __name__ == "__main__":
    key = jax.random.PRNGKey(0)
    k1, k2, k3 = jax.random.split(key, 3)

    N, Cin, H, W = 2, 4, 16, 16
    Cout = 8

    x = jax.random.normal(k1, (N, Cin, H, W), jnp.float32)
    w = jax.random.normal(k2, (Cout, Cin, 3, 3), jnp.float32) / jnp.sqrt(Cin * 9.0)
    b = jax.random.normal(k3, (Cout,), jnp.float32) * 0.1   # cancelled by train-mode BN
    gamma = jnp.ones((Cout,), jnp.float32)                  # BatchNorm2d default init
    beta = jnp.zeros((Cout,), jnp.float32)

    out = jax.block_until_ready(up_conv_forward(x, w, b, gamma, beta))

    ref = reference(x, w, b, gamma, beta)
    assert out.shape == (N, Cout, 2 * H, 2 * W), out.shape
    # f32 path typically agrees to ~1e-5; tolerance leaves margin for MXU/XLA
    # default f32 matmul/conv precision differences.
    err = float(jnp.max(jnp.abs(out - ref)))
    assert jnp.allclose(out, ref, atol=1e-3, rtol=1e-3), err

    print("KERNEL_OK")
</pallas_src>

<mosaic_0001>
module attributes {stable_mosaic.version = 11 : i64} {
  func.func @conv_phase_kernel(%arg0: i32, %arg1: memref<1x18x18x4xf32, #tpu.memory_space<vmem>>, %arg2: memref<36x128xf32, #tpu.memory_space<vmem>>, %arg3: memref<1x256x128xf32, #tpu.memory_space<vmem>>, %arg4: memref<1x2x128xf32, #tpu.memory_space<vmem>>) attributes {dimension_semantics = [#tpu.dimension_semantics<parallel>], iteration_bounds = array<i64: 2>, scalar_prefetch = 0 : i64, scratch_operands = 0 : i64, tpu.core_type = #tpu.core_type<tc>, window_params = [{transform_indices = @transform_0, window_bounds = array<i64: 1, 18, 18, 4>}, {pipeline_mode = #tpu.pipeline_mode<synchronous>, transform_indices = @transform_1, window_bounds = array<i64: 36, 128>}, {transform_indices = @transform_2, window_bounds = array<i64: 1, 256, 128>}, {transform_indices = @transform_3, window_bounds = array<i64: 1, 2, 128>}]} {
    %c0 = arith.constant 0 : index
    %c0_0 = arith.constant 0 : index
    %c0_1 = arith.constant 0 : index
    %c0_2 = arith.constant 0 : index
    %0 = vector.load %arg1[%c0, %c0_0, %c0_1, %c0_2] : memref<1x18x18x4xf32, #tpu.memory_space<vmem>>, vector<1x18x18x4xf32>
    %1 = vector.shape_cast %0 : vector<1x18x18x4xf32> to vector<18x18x4xf32>
    %2 = vector.extract_strided_slice %1 {offsets = [0, 0, 0], sizes = [16, 16, 4], strides = [1, 1, 1]} : vector<18x18x4xf32> to vector<16x16x4xf32>
    %3 = vector.shape_cast %2 : vector<16x16x4xf32> to vector<256x4xf32>
    %4 = vector.extract_strided_slice %1 {offsets = [0, 1, 0], sizes = [16, 16, 4], strides = [1, 1, 1]} : vector<18x18x4xf32> to vector<16x16x4xf32>
    %5 = vector.shape_cast %4 : vector<16x16x4xf32> to vector<256x4xf32>
    %6 = vector.extract_strided_slice %1 {offsets = [0, 2, 0], sizes = [16, 16, 4], strides = [1, 1, 1]} : vector<18x18x4xf32> to vector<16x16x4xf32>
    %7 = vector.shape_cast %6 : vector<16x16x4xf32> to vector<256x4xf32>
    %8 = vector.extract_strided_slice %1 {offsets = [1, 0, 0], sizes = [16, 16, 4], strides = [1, 1, 1]} : vector<18x18x4xf32> to vector<16x16x4xf32>
    %9 = vector.shape_cast %8 : vector<16x16x4xf32> to vector<256x4xf32>
    %10 = vector.extract_strided_slice %1 {offsets = [1, 1, 0], sizes = [16, 16, 4], strides = [1, 1, 1]} : vector<18x18x4xf32> to vector<16x16x4xf32>
    %11 = vector.shape_cast %10 : vector<16x16x4xf32> to vector<256x4xf32>
    %12 = vector.extract_strided_slice %1 {offsets = [1, 2, 0], sizes = [16, 16, 4], strides = [1, 1, 1]} : vector<18x18x4xf32> to vector<16x16x4xf32>
    %13 = vector.shape_cast %12 : vector<16x16x4xf32> to vector<256x4xf32>
    %14 = vector.extract_strided_slice %1 {offsets = [2, 0, 0], sizes = [16, 16, 4], strides = [1, 1, 1]} : vector<18x18x4xf32> to vector<16x16x4xf32>
    %15 = vector.shape_cast %14 : vector<16x16x4xf32> to vector<256x4xf32>
    %16 = vector.extract_strided_slice %1 {offsets = [2, 1, 0], sizes = [16, 16, 4], strides = [1, 1, 1]} : vector<18x18x4xf32> to vector<16x16x4xf32>
    %17 = vector.shape_cast %16 : vector<16x16x4xf32> to vector<256x4xf32>
    %18 = vector.extract_strided_slice %1 {offsets = [2, 2, 0], sizes = [16, 16, 4], strides = [1, 1, 1]} : vector<18x18x4xf32> to vector<16x16x4xf32>
    %19 = vector.shape_cast %18 : vector<16x16x4xf32> to vector<256x4xf32>
    %20 = tpu.concatenate %3, %5, %7, %9, %11, %13, %15, %17, %19 in 1 : vector<256x4xf32>, vector<256x4xf32>, vector<256x4xf32>, vector<256x4xf32>, vector<256x4xf32>, vector<256x4xf32>, vector<256x4xf32>, vector<256x4xf32>, vector<256x4xf32> -> vector<256x36xf32>
    %c0_3 = arith.constant 0 : index
    %c0_4 = arith.constant 0 : index
    %21 = vector.load %arg2[%c0_3, %c0_4] : memref<36x128xf32, #tpu.memory_space<vmem>>, vector<36x128xf32>
    %cst = arith.constant dense<0.000000e+00> : vector<256x128xf32>
    %22 = tpu.matmul %20, %21, %cst {dimension_numbers = #tpu.dot_dimension_numbers<[1], [0], [0], [1], [0, 0, 1, 1], [], []>} : vector<256x36xf32>, vector<36x128xf32>, vector<256x128xf32> -> vector<256x128xf32>
    %23 = vector.shape_cast %22 : vector<256x128xf32> to vector<1x256x128xf32>
    %c0_5 = arith.constant 0 : index
    %c0_6 = arith.constant 0 : index
    %c0_7 = arith.constant 0 : index
    %24 = vector.load %arg3[%c0_5, %c0_6, %c0_7] : memref<1x256x128xf32, #tpu.memory_space<vmem>>, vector<1x256x128xf32>
    tpu.vector_store %arg3[%c0_5, %c0_6, %c0_7], %23 {strides = array<i32>} : memref<1x256x128xf32, #tpu.memory_space<vmem>>, vector<1x256x128xf32>,
    %cst_8 = arith.constant dense<0.000000e+00> : vector<128xf32>
    %25 = vector.multi_reduction <add>, %22, %cst_8 [0] : vector<256x128xf32> to vector<128xf32>
    %26 = vector.shape_cast %25 : vector<128xf32> to vector<1x128xf32>
    %27 = arith.mulf %22, %22 : vector<256x128xf32>
    %cst_9 = arith.constant dense<0.000000e+00> : vector<128xf32>
    %28 = vector.multi_reduction <add>, %27, %cst_9 [0] : vector<256x128xf32> to vector<128xf32>
    %29 = vector.shape_cast %28 : vector<128xf32> to vector<1x128xf32>
    %30 = tpu.concatenate %26, %29 in 0 : vector<1x128xf32>, vector<1x128xf32> -> vector<2x128xf32>
    %31 = vector.shape_cast %30 : vector<2x128xf32> to vector<1x2x128xf32>
    %c0_10 = arith.constant 0 : index
    %c0_11 = arith.constant 0 : index
    %c0_12 = arith.constant 0 : index
    %32 = vector.load %arg4[%c0_10, %c0_11, %c0_12] : memref<1x2x128xf32, #tpu.memory_space<vmem>>, vector<1x2x128xf32>
    tpu.vector_store %arg4[%c0_10, %c0_11, %c0_12], %31 {strides = array<i32>} : memref<1x2x128xf32, #tpu.memory_space<vmem>>, vector<1x2x128xf32>,
    return
  }
  func.func @transform_0(%arg0: i32) -> (i32, i32, i32, i32) {
    %c0_i32 = arith.constant 0 : i32
    %c0_i32_0 = arith.constant 0 : i32
    %c0_i32_1 = arith.constant 0 : i32
    %c0_i32_2 = arith.constant 0 : i32
    return %arg0, %c0_i32, %c0_i32_0, %c0_i32_1 : i32, i32, i32, i32
  }
  func.func @transform_1(%arg0: i32) -> (i32, i32) {
    %c0_i32 = arith.constant 0 : i32
    %c0_i32_0 = arith.constant 0 : i32
    %c0_i32_1 = arith.constant 0 : i32
    return %c0_i32, %c0_i32_0 : i32, i32
  }
  func.func @transform_2(%arg0: i32) -> (i32, i32, i32) {
    %c0_i32 = arith.constant 0 : i32
    %c0_i32_0 = arith.constant 0 : i32
    %c0_i32_1 = arith.constant 0 : i32
    return %arg0, %c0_i32, %c0_i32_0 : i32, i32, i32
  }
  func.func @transform_3(%arg0: i32) -> (i32, i32, i32) {
    %c0_i32 = arith.constant 0 : i32
    %c0_i32_0 = arith.constant 0 : i32
    %c0_i32_1 = arith.constant 0 : i32
    return %arg0, %c0_i32, %c0_i32_0 : i32, i32, i32
  }
}

</mosaic_0001>

<bundles_post_ra>
// kernel: tpu_custom_call.1
= control target key start
LH: loop header
LB: loop body
LE: loop exit
PB: predicated region body
PF: predicated region fallthrough
CT: control target
= control target key end

     0   :  { %9 = vsyncpa [#allocation3], 0  ;;  %s4293_s0 = inlined_call_operand.vmem [shape: f32[2,18,18,4], index: 0, kind: input, shape index: {}]   ;;  %s4294_s1 = inlined_call_operand.vmem [shape: f32[36,128], index: 1, kind: input, shape index: {}]   ;;  %s4295_s2 = inlined_call_operand.hbm [shape: f32[2,256,128], index: 2, kind: output, shape index: {0}]   ;;  %s4296_s3 = inlined_call_operand.hbm [shape: f32[2,2,128], index: 3, kind: output, shape index: {1}]  }
   0x1   :  { %11 = vsyncpa [#allocation3 + $0x1], 0 }
   0x2   :  { %12 = vsyncpa [#allocation5], 0 }
   0x3   :  { %14 = vsyncpa [#allocation5 + $0x1], 0  ;;  %s2267_s12 = smov 0   ;;  %s2269_s13 = smov 0  }
   0x4   :  { %s2271_s14 = smov 0   ;;  %s2273_s15 = smov 0  }
   0x5 LB: > { %s2288_s16 = sadd.s32 4294967295, %s2236_s15   ;;  %s1992_s17 = sadd.s32 4294967294, %s2236_s15   ;;  %s2236_s15 = sphi %s2273_s15, %s4706_s15   ;;  %s2232_s14 = sphi %s2271_s14, %s4705_s14   ;;  %s2228_s13 = sphi %s2269_s13, %s4704_s13   ;;  %s2224_s12 = sphi %s2267_s12, %s4703_s12  }
   0x6   : > { %s2292_s18 = sadd.s32 1, %s2236_s15   ;;  %s74_s19 = sadd.s32 1, %s2232_s14 }
   0x7   : > { %s71_s20 = ssub.s32 %s2236_s15, %s2292_s18  ;;  %p84_p0 = scmp.ne.s32.totalorder %s2232_s14, %s2228_s13 }
   0x8   : > { %p72_p1 = scmp.eq.s32.totalorder %s71_s20, 0  ;;  %p85_p2 = scmp.eq.s32.totalorder %s2288_s16, 1 }
   0x9   : > { %p90_p3 = scmp.ne.s32.totalorder %s2228_s13, %s2224_s12  ;;  %p91_p4 = scmp.eq.s32.totalorder %s1992_s17, 1 }
   0xa   : > { %s2303_s21 = scalar_select %p72_p1, %s2232_s14, %s74_s19  }
   0xb   : > { %p2305_p5 = por %p85_p2, %p84_p0  ;;  %p2309_p6 = por %p91_p4, %p90_p3 }
   0xc   : > { %p1995_p7 = scmp.ge.s32.totalorder %s2236_s15, 1  ;;  %p146_p8 = scmp.lt.s32.totalorder %s2236_s15, 3 }
   0xe   : > { %p147_p9 = pnand %p1995_p7, %p146_p8 }
  0x10   : > { %150 = sbr.rel (%p147_p9) target bundleno = 982 (0x3d6), region = 28 }
  0x15   : > { %p175_p10 = scmp.lt.s32.totalorder %s2288_s16, 1  ;;  %vm282_vm0 = vcmask 1046528   ;;  %s2238_s29 = smov 4   ;;  %vm363_vm1 = vcmask 1045504   ;;  %vm1238_vm2 = vcmask 31744   ;;  %vm1271_vm3 = vcmask 64512  }
  0x16   : > { %s2239_s30 = smov 8   ;;  %s2240_s4 = smov 12   ;;  %vm1304_vm4 = vcmask 97280   ;;  %vm1337_vm5 = vcmask 130048   ;;  %vm1370_vm6 = vcmask 162816   ;;  %vm1604_vm7 = vcmask 1043456  }
  0x17   : > { %s176_s24 = scalar_select %p175_p10, %s2288_s16, 1  ;;  %vm1403_vm8 = vcmask 195584   ;;  %vm1436_vm9 = vcmask 228352   ;;  %vm1469_vm10 = vcmask 261120   ;;  %vm1507_vm11 = vcmask 293888  }
  0x18   : > { %s2241_s5 = smov 16   ;;  %s2242_s6 = smov 20  }
  0x19   : > { %s2055_s25 = smul.u32 432, %s176_s24  ;;  %s2243_s7 = smov 28  }
  0x1a   : > { %s2244_s8 = smov 24   ;;  %s2245_s9 = smov 32  }
  0x1b   : > { %s2320_s28 = scalar_lea.vmem %s4293_s0, %s2055_s25  ;;  %s2162_s26 = scalar_lea.hbm %s4295_s2, 512 }
  0x1c   : > { %v2323_v0 = vld [vmem:[%s2320_s28 + $0x30] sm:$0xff]  ;;  %v2326_v1 = vld [vmem:[%s2320_s28 + $0x38] sm:$0xff]  ;;  %v2334_v5 = vld [vmem:[%s2320_s28 + $0x20] sm:$0xff] }
  0x1d   : > { %v2329_v2 = vld [vmem:[%s2320_s28 + $0x18] sm:$0xff]  ;;  %v293_v3 = vrot.slane %v2323_v0, 1  ;;  %v294_v4 = vrot.slane %v2326_v1, 1  ;;  %v2338_v7 = vld [vmem:[%s2320_s28] sm:$0xff]  ;;  %v2341_v8 = vld [vmem:[%s2320_s28 + $0x8] sm:$0xff]  ;;  %v289_v9 = vrot.slane %v2334_v5, 1 }
  0x1e   : > { %v288_v6 = vrot.slane %v2329_v2, 1  ;;  %v283_v10 = vrot.slane %v2338_v7, 1  ;;  %v284_v11 = vrot.slane %v2341_v8, 1  ;;  %v2347_v12 = vld [vmem:[%s2320_s28 + $0x40] sm:$0x3]  ;;  %v2381_v25 = vld [vmem:[%s2320_s28 + $0x68] sm:$0xff] }
  0x1f   : > { %v2350_v13 = vsel %vm282_vm0, %v293_v3, %v294_v4  ;;  %v2353_v14 = vld [vmem:[%s2320_s28 + $0x28] sm:$0x3]  ;;  %v2356_v15 = vld [vmem:[%s2320_s28 + $0x10] sm:$0x3]  ;;  %v296_v18 = vrot.slane %v2347_v12, 1  ;;  %v2378_v24 = vld [vmem:[%s2320_s28 + $0x60] sm:$0xff] }
  0x20   : > { %478 = vrot.lane.b32.xlu2 %v2350_v13, %s2238_s29  ;;  %v2361_v16 = vsel %vm282_vm0, %v288_v6, %v289_v9  ;;  %v285_v17 = vsel %vm282_vm0, %v283_v10, %v284_v11  ;;  %v291_v19 = vrot.slane %v2353_v14, 1  ;;  %v286_v20 = vrot.slane %v2356_v15, 1  ;;  %v2384_v26 = vld [vmem:[%s2320_s28 + $0x50] sm:$0xff]  ;;  %v2387_v27 = vld [vmem:[%s2320_s28 + $0x58] sm:$0x3]  ;;  %v2390_v28 = vld [vmem:[%s2320_s28 + $0x48] sm:$0xff] }
  0x21   : > { %474 = vrot.lane.b32.xlu1 %v2361_v16, %s2238_s29  ;;  %470 = vrot.lane.b32.xlu0 %v285_v17, %s2238_s29  ;;  %v2371_v21 = vsel %vm282_vm0, %v294_v4, %v296_v18  ;;  %v303_v29 = vrot.slane %v2378_v24, 1  ;;  %v304_v30 = vrot.slane %v2381_v25, 1  ;;  %v299_v31 = vrot.slane %v2384_v26, 1  ;;  %v2412_v37 = vld [vmem:[%s2320_s28 + $0x80] sm:$0xff]  ;;  %v2415_v38 = vld [vmem:[%s2320_s28 + $0x88] sm:$0x3] }
  0x22   : > { %v2374_v22 = vsel %vm282_vm0, %v289_v9, %v291_v19  ;;  %v287_v23 = vsel %vm282_vm0, %v284_v11, %v286_v20  ;;  %v301_v32 = vrot.slane %v2387_v27, 1  ;;  %v298_v33 = vrot.slane %v2390_v28, 1  ;;  %v2418_v39 = vld [vmem:[%s2320_s28 + $0x78] sm:$0xff]  ;;  %v2421_v40 = vld [vmem:[%s2320_s28 + $0x70] sm:$0x3]  ;;  %v2443_v48 = vld [vmem:[%s2320_s28 + $0xa8] sm:$0xff] }
  0x23   : > { %v2403_v34 = vsel %vm282_vm0, %v303_v29, %v304_v30  ;;  %v309_v41 = vrot.slane %v2412_v37, 1  ;;  %v311_v42 = vrot.slane %v2415_v38, 1  ;;  %v308_v43 = vrot.slane %v2418_v39, 1  ;;  %v2446_v49 = vld [vmem:[%s2320_s28 + $0xb0] sm:$0xff]  ;;  %v2449_v50 = vld [vmem:[%s2320_s28 + $0x98] sm:$0xff]  ;;  %v2478_v61 = vld [vmem:[%s2320_s28 + $0xc8] sm:$0xff] }
  0x24   : > { %4386 = vst [vmem:[#allocation8_spill] sm:$0xff] %v2403_v34  ;;  %v2406_v35 = vsel %vm282_vm0, %v299_v31, %v301_v32  ;;  %v2409_v36 = vsel %vm282_vm0, %v298_v33, %v299_v31  ;;  %v306_v44 = vrot.slane %v2421_v40, 1  ;;  %v2452_v51 = vld [vmem:[%s2320_s28 + $0xa0] sm:$0x3]  ;;  %v2455_v52 = vld [vmem:[%s2320_s28 + $0x90] sm:$0xff]  ;;  %v318_v53 = vrot.slane %v2443_v48, 1 }
  0x25   : > { %v2434_v45 = vsel %vm282_vm0, %v309_v41, %v311_v42  ;;  %v2437_v46 = vsel %vm282_vm0, %v308_v43, %v309_v41  ;;  %v319_v54 = vrot.slane %v2446_v49, 1  ;;  %v314_v55 = vrot.slane %v2449_v50, 1  ;;  %v2481_v62 = vld [vmem:[%s2320_s28 + $0xd0] sm:$0x3]  ;;  %v2484_v63 = vld [vmem:[%s2320_s28 + $0xc0] sm:$0xff]  ;;  %v2512_v20 = vld [vmem:[%s2320_s28 + $0xf8] sm:$0xff] }
  0x26   : > { %4387 = vst [vmem:[#allocation9_spill] sm:$0xff] %v2434_v45  ;;  %v2440_v47 = vsel %vm282_vm0, %v304_v30, %v306_v44  ;;  %v316_v56 = vrot.slane %v2452_v51, 1  ;;  %v313_v57 = vrot.slane %v2455_v52, 1  ;;  %v2487_v3 = vld [vmem:[%s2320_s28 + $0xb8] sm:$0x3]  ;;  %v324_v4 = vrot.slane %v2478_v61, 1 }
  0x27   : > { %4388 = vst [vmem:[#allocation10_spill] sm:$0xff] %v2437_v46  ;;  %v2469_v58 = vsel %vm282_vm0, %v318_v53, %v319_v54  ;;  %v326_v6 = vrot.slane %v2481_v62, 1  ;;  %v323_v9 = vrot.slane %v2484_v63, 1  ;;  %v321_v10 = vrot.slane %v2487_v3, 1  ;;  %v2509_v19 = vld [vmem:[%s2320_s28 + $0xf0] sm:$0xff]  ;;  %v2521_v30 = vld [vmem:[%s2320_s28 + $0xd8] sm:$0xff] }
  0x28   : > { %480 = vrot.lane.b32.xlu2 %v2371_v21, %s2238_s29  ;;  %4389 = vst [vmem:[#allocation11_spill] sm:$0xff] %v2440_v47  ;;  %v2472_v59 = vsel %vm282_vm0, %v314_v55, %v316_v56  ;;  %v2475_v60 = vsel %vm282_vm0, %v313_v57, %v314_v55  ;;  %v2518_v29 = vld [vmem:[%s2320_s28 + $0xe8] sm:$0x3]  ;;  %v333_v31 = vrot.slane %v2509_v19, 1  ;;  %v334_v32 = vrot.slane %v2512_v20, 1 }
  0x29   : > { %476 = vrot.lane.b32.xlu1 %v2374_v22, %s2238_s29  ;;  %472 = vrot.lane.b32.xlu0 %v287_v23, %s2238_s29  ;;  %4390 = vst [vmem:[#allocation12_spill] sm:$0xff] %v2469_v58  ;;  %v2500_v11 = vsel %vm282_vm0, %v324_v4, %v326_v6  ;;  %v2503_v17 = vsel %vm282_vm0, %v323_v9, %v324_v4  ;;  %v2515_v23 = vld [vmem:[%s2320_s28 + $0xe0] sm:$0xff]  ;;  %v331_v41 = vrot.slane %v2518_v29, 1  ;;  %v328_v42 = vrot.slane %v2521_v30, 1  ;;  %v2547_v55 = vld [vmem:[%s2320_s28 + $0x118] sm:$0x3] }
  0x2a   : > { %4391 = vst [vmem:[#allocation13_spill] sm:$0xff] %v2472_v59  ;;  %v2506_v18 = vsel %vm282_vm0, %v319_v54, %v321_v10  ;;  %v329_v33 = vrot.slane %v2515_v23, 1  ;;  %v2535_v43 = vsel %vm282_vm0, %v333_v31, %v334_v32  ;;  %v2544_v54 = vld [vmem:[%s2320_s28 + $0x110] sm:$0xff]  ;;  %v2550_v56 = vld [vmem:[%s2320_s28 + $0x108] sm:$0xff]  ;;  %v2553_v57 = vld [vmem:[%s2320_s28 + $0x100] sm:$0x3] }
  0x2b   : > { %4392 = vst [vmem:[#allocation14_spill] sm:$0xff] %v2475_v60  ;;  %v339_v4 = vrot.slane %v2544_v54, 1  ;;  %v341_v6 = vrot.slane %v2547_v55, 1  ;;  %v338_v9 = vrot.slane %v2550_v56, 1  ;;  %v336_v10 = vrot.slane %v2553_v57, 1 }
  0x2c   : > { %4393 = vst [vmem:[#allocation15_spill] sm:$0xff] %v2500_v11  ;;  %v2538_v44 = vsel %vm282_vm0, %v329_v33, %v331_v41  ;;  %v2541_v53 = vsel %vm282_vm0, %v328_v42, %v329_v33  ;;  %v2575_v42 = vld [vmem:[%s2320_s28 + $0x138] sm:$0xff] }
  0x2d   : > { %4394 = vst [vmem:[#allocation16_spill] sm:$0xff] %v2503_v17  ;;  %v2566_v31 = vsel %vm282_vm0, %v339_v4, %v341_v6  ;;  %v2569_v33 = vsel %vm282_vm0, %v338_v9, %v339_v4  ;;  %v2572_v41 = vsel %vm282_vm0, %v334_v32, %v336_v10  ;;  %v2587_v6 = vld [vmem:[%s2320_s28 + $0x120] sm:$0xff]  ;;  %v348_v32 = vrot.slane %v2575_v42, 1 }
  0x2e   : > { %4395 = vst [vmem:[#allocation17_spill] sm:$0xff] %v2506_v18 }
  0x2f   : > { %4396 = vst [vmem:[#allocation18_spill] sm:$0xff] %v2535_v43 }
  0x30   : > { %486 = vrot.lane.b32.xlu2 %v2403_v34, %s2238_s29  ;;  %4397 = vst [vmem:[#allocation19_spill] sm:$0xff] %v2538_v44  ;;  %v2647_v34 = vld [vmem:[%s2320_s28 + $0x168] sm:$0xff] }
  0x31   : > { %484 = vrot.lane.b32.xlu1 %v2406_v35, %s2238_s29  ;;  %482 = vrot.lane.b32.xlu0 %v2409_v36, %s2238_s29  ;;  %4398 = vst [vmem:[#allocation20_spill] sm:$0xff] %v2541_v53 }
  0x32   : > { %4399 = vst [vmem:[#allocation21_spill] sm:$0xff] %v2566_v31 }
  0x33   : > { %4400 = vst [vmem:[#allocation22_spill] sm:$0xff] %v2569_v33 }
  0x34   : > { %4401 = vst [vmem:[#allocation23_spill] sm:$0xff] %v2572_v41 }
  0x35   : > { %4409 = vst [vmem:[#allocation31_spill] sm:$0xff] %v2647_v34 }
  0x38   : > { %492 = vrot.lane.b32.xlu2 %v2434_v45, %s2238_s29  ;;  %v2619_v45 = vld [vmem:[%s2320_s28 + $0x148] sm:$0x3] }
  0x39   : > { %490 = vrot.lane.b32.xlu1 %v2437_v46, %s2238_s29  ;;  %488 = vrot.lane.b32.xlu0 %v2440_v47, %s2238_s29 }
  0x40   : > { %498 = vrot.lane.b32.xlu2 %v2469_v58, %s2238_s29 }
  0x41   : > { %496 = vrot.lane.b32.xlu1 %v2472_v59, %s2238_s29  ;;  %494 = vrot.lane.b32.xlu0 %v2475_v60, %s2238_s29 }
  0x48   : > { %504 = vrot.lane.b32.xlu2 %v2500_v11, %s2238_s29  ;;  %v2581_v11 = vld [vmem:[%s2320_s28 + $0x128] sm:$0xff] }
  0x49   : > { %502 = vrot.lane.b32.xlu1 %v2503_v17, %s2238_s29  ;;  %500 = vrot.lane.b32.xlu0 %v2506_v18, %s2238_s29  ;;  %v344_v9 = vrot.slane %v2581_v11, 1  ;;  %v2613_v18 = vld [vmem:[%s2320_s28 + $0x160] sm:$0x3]  ;;  %v2616_v17 = vld [vmem:[%s2320_s28 + $0x150] sm:$0xff] }
  0x50   : > { %510 = vrot.lane.b32.xlu2 %v2535_v43, %s2238_s29  ;;  %v2578_v43 = vld [vmem:[%s2320_s28 + $0x140] sm:$0xff] }
  0x51   : > { %508 = vrot.lane.b32.xlu1 %v2538_v44, %s2238_s29  ;;  %506 = vrot.lane.b32.xlu0 %v2541_v53, %s2238_s29  ;;  %4402 = vst [vmem:[#allocation24_spill] sm:$0xff] %v2578_v43  ;;  %v2584_v53 = vld [vmem:[%s2320_s28 + $0x130] sm:$0x3]  ;;  %v349_v4 = vrot.slane %v2578_v43, 1  ;;  %v343_v44 = vrot.slane %v2587_v6, 1 }
  0x52   : > { %v346_v10 = vrot.slane %v2584_v53, 1 }
  0x53   : > { %v2601_v58 = vsel %vm282_vm0, %v348_v32, %v349_v4  ;;  %v356_v32 = vrot.slane %v2613_v18, 1 }
  0x54   : > { %4403 = vst [vmem:[#allocation25_spill] sm:$0xff] %v2601_v58 }
  0x58   : > { %516 = vrot.lane.b32.xlu2 %v2566_v31, %s2238_s29  ;;  %v2604_v31 = vsel %vm282_vm0, %v344_v9, %v346_v10  ;;  %v351_v10 = vrot.slane %v2619_v45, 1 }
  0x59   : > { %514 = vrot.lane.b32.xlu1 %v2569_v33, %s2238_s29  ;;  %512 = vrot.lane.b32.xlu0 %v2572_v41, %s2238_s29  ;;  %4404 = vst [vmem:[#allocation26_spill] sm:$0xff] %v2604_v31  ;;  %v2607_v33 = vsel %vm282_vm0, %v343_v44, %v344_v9  ;;  %v2610_v41 = vld [vmem:[%s2320_s28 + $0x158] sm:$0xff]  ;;  %v353_v9 = vrot.slane %v2616_v17, 1 }
  0x5a   : > { %4405 = vst [vmem:[#allocation27_spill] sm:$0xff] %v2607_v33  ;;  %v354_v44 = vrot.slane %v2610_v41, 1 }
  0x5c   : > { %v2632_v60 = vsel %vm282_vm0, %v354_v44, %v356_v32  ;;  %v2635_v59 = vsel %vm282_vm0, %v353_v9, %v354_v44  ;;  %v364_v44 = vrot.slane %v2338_v7, 2  ;;  %v370_v7 = vrot.slane %v2334_v5, 2 }
  0x5d   : > { %4406 = vst [vmem:[#allocation28_spill] sm:$0xff] %v2632_v60 }
  0x5e   : > { %4407 = vst [vmem:[#allocation29_spill] sm:$0xff] %v2635_v59 }
  0x60   : > { %522 = vrot.lane.b32.xlu2 %v2601_v58, %s2238_s29  ;;  %v2638_v58 = vsel %vm282_vm0, %v349_v4, %v351_v10  ;;  %v365_v4 = vrot.slane %v2341_v8, 2  ;;  %v358_v10 = vrot.slane %v2647_v34, 1  ;;  %v372_v8 = vrot.slane %v2353_v14, 2 }
  0x61   : > { %520 = vrot.lane.b32.xlu1 %v2604_v31, %s2238_s29  ;;  %518 = vrot.lane.b32.xlu0 %v2607_v33, %s2238_s29  ;;  %4408 = vst [vmem:[#allocation30_spill] sm:$0xff] %v2638_v58  ;;  %v2641_v31 = vld [vmem:[%s2320_s28 + $0x170] sm:$0xff]  ;;  %v2644_v33 = vld [vmem:[%s2320_s28 + $0x178] sm:$0x3]  ;;  %v379_v14 = vrot.slane %v2390_v28, 2 }
  0x62   : > { %v359_v32 = vrot.slane %v2641_v31, 1  ;;  %v361_v9 = vrot.slane %v2644_v33, 1  ;;  %v366_v47 = vsel %vm363_vm1, %v364_v44, %v365_v4  ;;  %v369_v44 = vrot.slane %v2329_v2, 2 }
  0x68   : > { %528 = vrot.lane.b32.xlu2 %v2632_v60, %s2238_s29  ;;  %v2662_v60 = vsel %vm282_vm0, %v359_v32, %v361_v9  ;;  %v367_v9 = vrot.slane %v2356_v15, 2  ;;  %v380_v15 = vrot.slane %v2384_v26, 2 }
  0x69   : > { %526 = vrot.lane.b32.xlu1 %v2635_v59, %s2238_s29  ;;  %524 = vrot.lane.b32.xlu0 %v2638_v58, %s2238_s29  ;;  %4410 = vst [vmem:[#allocation32_spill] sm:$0xff] %v2662_v60  ;;  %v2665_v59 = vsel %vm282_vm0, %v358_v10, %v359_v32  ;;  %v2677_v32 = vsel %vm363_vm1, %v370_v7, %v372_v8  ;;  %v375_v8 = vrot.slane %v2326_v1, 2 }
  0x6a   : > { %4411 = vst [vmem:[#allocation33_spill] sm:$0xff] %v2665_v59  ;;  %v2680_v10 = vsel %vm363_vm1, %v369_v44, %v370_v7  ;;  %v377_v7 = vrot.slane %v2347_v12, 2  ;;  %v2696_v44 = vsel %vm363_vm1, %v379_v14, %v380_v15  ;;  %v385_v12 = vrot.slane %v2381_v25, 2 }
  0x6b   : > { %4412 = vst [vmem:[#allocation34_spill] sm:$0xff] %v2677_v32  ;;  %v387_v14 = vrot.slane %v2421_v40, 2  ;;  %v395_v40 = vrot.slane %v2449_v50, 2 }
  0x6c   : > { %4414 = vst [vmem:[#allocation36_spill] sm:$0xff] %v2696_v44 }
  0x70   : > { %566 = vrot.lane.b32.xlu2 %v366_v47, %s2239_s30  ;;  %v368_v47 = vsel %vm363_vm1, %v365_v4, %v367_v9  ;;  %v374_v4 = vrot.slane %v2323_v0, 2  ;;  %v2699_v9 = vsel %vm363_vm1, %v375_v8, %v377_v7  ;;  %v384_v7 = vrot.slane %v2378_v24, 2 }
  0x71   : > { %532 = vrot.lane.b32.xlu1 %v2662_v60, %s2238_s29  ;;  %530 = vrot.lane.b32.xlu0 %v2665_v59, %s2238_s29 }
  0x78   : > { %572 = vrot.lane.b32.xlu2 %v2677_v32, %s2239_s30 }
  0x79   : > { %570 = vrot.lane.b32.xlu1 %v2680_v10, %s2239_s30  ;;  %568 = vrot.lane.b32.xlu0 %v368_v47, %s2239_s30  ;;  %v2702_v47 = vsel %vm363_vm1, %v374_v4, %v375_v8  ;;  %v382_v8 = vrot.slane %v2387_v27, 2  ;;  %v2717_v4 = vsel %vm363_vm1, %v385_v12, %v387_v14  ;;  %v394_v27 = vrot.slane %v2455_v52, 2 }
  0x7a   : > { %v2690_v59 = vpop.permute.xlu2 %478  ;;  %4416 = vst [vmem:[#allocation38_spill] sm:$0xff] %v2717_v4 }
  0x7b   : > { %4413 = vst [vmem:[#allocation35_spill] sm:$0xff] %v2690_v59  ;;  %v2723_v32 = vsel %vm363_vm1, %v380_v15, %v382_v8  ;;  %v392_v15 = vrot.slane %v2415_v38, 2  ;;  %v2739_v8 = vsel %vm363_vm1, %v394_v27, %v395_v40  ;;  %v400_v38 = vrot.slane %v2446_v49, 2 }
  0x7c   : > { %4418 = vst [vmem:[#allocation40_spill] sm:$0xff] %v2723_v32  ;;  %v402_v27 = vrot.slane %v2487_v3, 2  ;;  %v410_v3 = vrot.slane %v2515_v23, 2 }
  0x7d   : > { %4420 = vst [vmem:[#allocation42_spill] sm:$0xff] %v2739_v8 }
  0x80   : > { %578 = vrot.lane.b32.xlu2 %v2696_v44, %s2239_s30  ;;  %v2720_v44 = vsel %vm363_vm1, %v384_v7, %v385_v12  ;;  %v390_v12 = vrot.slane %v2412_v37, 2  ;;  %v389_v7 = vrot.slane %v2418_v39, 2 }
  0x81   : > { %576 = vrot.lane.b32.xlu1 %v2699_v9, %s2239_s30  ;;  %574 = vrot.lane.b32.xlu0 %v2702_v47, %s2239_s30  ;;  %4417 = vst [vmem:[#allocation39_spill] sm:$0xff] %v2720_v44 }
  0x82   : > { %v2712_v59 = vpop.permute.xlu2 %480 }
  0x83   : > { %4415 = vst [vmem:[#allocation37_spill] sm:$0xff] %v2712_v59  ;;  %v2742_v59 = vsel %vm363_vm1, %v390_v12, %v392_v15  ;;  %v399_v15 = vrot.slane %v2443_v48, 2 }
  0x84   : > { %4421 = vst [vmem:[#allocation43_spill] sm:$0xff] %v2742_v59 }
  0x88   : > { %584 = vrot.lane.b32.xlu2 %v2717_v4, %s2239_s30  ;;  %v2745_v4 = vsel %vm363_vm1, %v389_v7, %v390_v12  ;;  %v397_v12 = vrot.slane %v2452_v51, 2  ;;  %v409_v51 = vrot.slane %v2521_v30, 2 }
  0x89   : > { %582 = vrot.lane.b32.xlu1 %v2720_v44, %s2239_s30  ;;  %580 = vrot.lane.b32.xlu0 %v2723_v32, %s2239_s30  ;;  %4422 = vst [vmem:[#allocation44_spill] sm:$0xff] %v2745_v4 }
  0x8a   : > { %v2733_v14 = vpop.permute.xlu2 %486 }
  0x8b   : > { %4419 = vst [vmem:[#allocation41_spill] sm:$0xff] %v2733_v14 }
  0x90   : > { %590 = vrot.lane.b32.xlu2 %v2739_v8, %s2239_s30  ;;  %v2764_v8 = vsel %vm363_vm1, %v400_v38, %v402_v27 }
  0x91   : > { %588 = vrot.lane.b32.xlu1 %v2742_v59, %s2239_s30  ;;  %586 = vrot.lane.b32.xlu0 %v2745_v4, %s2239_s30  ;;  %4426 = vst [vmem:[#allocation48_spill] sm:$0xff] %v2764_v8  ;;  %v2767_v59 = vsel %vm363_vm1, %v399_v15, %v400_v38  ;;  %v2770_v4 = vsel %vm363_vm1, %v395_v40, %v397_v12  ;;  %v405_v38 = vrot.slane %v2478_v61, 2  ;;  %v407_v40 = vrot.slane %v2481_v62, 2 }
  0x92   : > { %v2755_v14 = vpop.permute.xlu2 %492  ;;  %4427 = vst [vmem:[#allocation49_spill] sm:$0xff] %v2767_v59  ;;  %v404_v15 = vrot.slane %v2484_v63, 2  ;;  %v415_v62 = vrot.slane %v2512_v20, 2 }
  0x93   : > { %4423 = vst [vmem:[#allocation45_spill] sm:$0xff] %v2755_v14  ;;  %v2759_v7 = vpop.permute.xlu1 %474  ;;  %v2761_v32 = vpop.permute.xlu0 %470 }
  0x94   : > { %4424 = vst [vmem:[#allocation46_spill] sm:$0xff] %v2759_v7  ;;  %v2790_v7 = vsel %vm363_vm1, %v409_v51, %v410_v3  ;;  %v417_v51 = vrot.slane %v2553_v57, 2  ;;  %v425_v57 = vrot.slane %v2581_v11, 2 }
  0x95   : > { %4425 = vst [vmem:[#allocation47_spill] sm:$0xff] %v2761_v32  ;;  %v2793_v32 = vsel %vm363_vm1, %v405_v38, %v407_v40  ;;  %v414_v40 = vrot.slane %v2509_v19, 2 }
  0x96   : > { %4431 = vst [vmem:[#allocation53_spill] sm:$0xff] %v2790_v7 }
  0x97   : > { %4432 = vst [vmem:[#allocation54_spill] sm:$0xff] %v2793_v32 }
  0x98   : > { %596 = vrot.lane.b32.xlu2 %v2764_v8, %s2239_s30  ;;  %v2796_v8 = vsel %vm363_vm1, %v404_v15, %v405_v38  ;;  %v412_v38 = vrot.slane %v2518_v29, 2  ;;  %v424_v29 = vrot.slane %v2587_v6, 2 }
  0x99   : > { %594 = vrot.lane.b32.xlu1 %v2767_v59, %s2239_s30  ;;  %592 = vrot.lane.b32.xlu0 %v2770_v4, %s2239_s30  ;;  %4433 = vst [vmem:[#allocation55_spill] sm:$0xff] %v2796_v8 }
  0x9a   : > { %v2780_v27 = vpop.permute.xlu2 %498 }
  0x9b   : > { %4428 = vst [vmem:[#allocation50_spill] sm:$0xff] %v2780_v27  ;;  %v2785_v12 = vpop.permute.xlu1 %476  ;;  %v2787_v14 = vpop.permute.xlu0 %472  ;;  %v2815_v27 = vsel %vm363_vm1, %v415_v62, %v417_v51 }
  0x9c   : > { %4429 = vst [vmem:[#allocation51_spill] sm:$0xff] %v2785_v12 }
  0x9d   : > { %4430 = vst [vmem:[#allocation52_spill] sm:$0xff] %v2787_v14 }
  0x9e   : > { %4437 = vst [vmem:[#allocation59_spill] sm:$0xff] %v2815_v27 }
  0xa0   : > { %602 = vrot.lane.b32.xlu2 %v2790_v7, %s2239_s30  ;;  %v2818_v7 = vsel %vm363_vm1, %v414_v40, %v415_v62  ;;  %v420_v62 = vrot.slane %v2544_v54, 2  ;;  %v419_v40 = vrot.slane %v2550_v56, 2 }
  0xa1   : > { %600 = vrot.lane.b32.xlu1 %v2793_v32, %s2239_s30  ;;  %598 = vrot.lane.b32.xlu0 %v2796_v8, %s2239_s30  ;;  %v2821_v8 = vsel %vm363_vm1, %v410_v3, %v412_v38  ;;  %v422_v3 = vrot.slane %v2547_v55, 2  ;;  %v430_v55 = vrot.slane %v2578_v43, 2 }
  0xa2   : > { %v2806_v12 = vpop.permute.xlu2 %504  ;;  %4438 = vst [vmem:[#allocation60_spill] sm:$0xff] %v2821_v8 }
  0xa3   : > { %4434 = vst [vmem:[#allocation56_spill] sm:$0xff] %v2806_v12  ;;  %v2810_v15 = vpop.permute.xlu1 %484  ;;  %v2812_v14 = vpop.permute.xlu0 %482  ;;  %v2844_v12 = vsel %vm363_vm1, %v420_v62, %v422_v3  ;;  %v429_v3 = vrot.slane %v2575_v42, 2 }
  0xa4   : > { %4435 = vst [vmem:[#allocation57_spill] sm:$0xff] %v2810_v15 }
  0xa5   : > { %4436 = vst [vmem:[#allocation58_spill] sm:$0xff] %v2812_v14  ;;  %v2841_v14 = vsel %vm363_vm1, %v424_v29, %v425_v57  ;;  %v432_v29 = vrot.slane %v2619_v45, 2  ;;  %v439_v45 = vrot.slane %v2647_v34, 2 }
  0xa6   : > { %4442 = vst [vmem:[#allocation64_spill] sm:$0xff] %v2841_v14 }
  0xa7   : > { %4443 = vst [vmem:[#allocation65_spill] sm:$0xff] %v2844_v12 }
  0xa8   : > { %608 = vrot.lane.b32.xlu2 %v2815_v27, %s2239_s30  ;;  %v2847_v27 = vsel %vm363_vm1, %v419_v40, %v420_v62  ;;  %v427_v62 = vrot.slane %v2584_v53, 2  ;;  %v440_v53 = vrot.slane %v2641_v31, 2 }
  0xa9   : > { %606 = vrot.lane.b32.xlu1 %v2818_v7, %s2239_s30  ;;  %604 = vrot.lane.b32.xlu0 %v2821_v8, %s2239_s30  ;;  %4444 = vst [vmem:[#allocation66_spill] sm:$0xff] %v2847_v27 }
  0xaa   : > { %v2831_v51 = vpop.permute.xlu2 %510 }
  0xab   : > { %4439 = vst [vmem:[#allocation61_spill] sm:$0xff] %v2831_v51  ;;  %v2836_v38 = vpop.permute.xlu1 %490  ;;  %v2838_v15 = vpop.permute.xlu0 %488  ;;  %v2866_v51 = vsel %vm363_vm1, %v430_v55, %v432_v29 }
  0xac   : > { %4440 = vst [vmem:[#allocation62_spill] sm:$0xff] %v2836_v38 }
  0xad   : > { %4441 = vst [vmem:[#allocation63_spill] sm:$0xff] %v2838_v15 }
  0xae   : > { %4448 = vst [vmem:[#allocation70_spill] sm:$0xff] %v2866_v51 }
  0xb0   : > { %614 = vrot.lane.b32.xlu2 %v2841_v14, %s2239_s30  ;;  %v2869_v14 = vsel %vm363_vm1, %v429_v3, %v430_v55  ;;  %v435_v55 = vrot.slane %v2610_v41, 2  ;;  %v434_v3 = vrot.slane %v2616_v17, 2 }
  0xb1   : > { %612 = vrot.lane.b32.xlu1 %v2844_v12, %s2239_s30  ;;  %610 = vrot.lane.b32.xlu0 %v2847_v27, %s2239_s30  ;;  %4449 = vst [vmem:[#allocation71_spill] sm:$0xff] %v2869_v14  ;;  %v2872_v27 = vsel %vm363_vm1, %v425_v57, %v427_v62  ;;  %v437_v57 = vrot.slane %v2613_v18, 2 }
  0xb2   : > { %v2857_v38 = vpop.permute.xlu2 %516  ;;  %4450 = vst [vmem:[#allocation72_spill] sm:$0xff] %v2872_v27 }
  0xb3   : > { %4445 = vst [vmem:[#allocation67_spill] sm:$0xff] %v2857_v38  ;;  %v2861_v40 = vpop.permute.xlu1 %496  ;;  %v2863_v15 = vpop.permute.xlu0 %494  ;;  %v2892_v38 = vsel %vm363_vm1, %v439_v45, %v440_v53  ;;  %v442_v45 = vrot.slane %v2644_v33, 2 }
  0xb4   : > { %4446 = vst [vmem:[#allocation68_spill] sm:$0xff] %v2861_v40  ;;  %v2895_v40 = vsel %vm363_vm1, %v435_v55, %v437_v57 }
  0xb5   : > { %4447 = vst [vmem:[#allocation69_spill] sm:$0xff] %v2863_v15 }
  0xb6   : > { %4453 = vst [vmem:[#allocation75_spill] sm:$0xff] %v2895_v40 }
  0xb8   : > { %620 = vrot.lane.b32.xlu2 %v2866_v51, %s2239_s30  ;;  %v2898_v51 = vsel %vm363_vm1, %v434_v3, %v435_v55  ;;  %v2914_v55 = vsel %vm363_vm1, %v440_v53, %v442_v45 }
  0xb9   : > { %618 = vrot.lane.b32.xlu1 %v2869_v14, %s2239_s30  ;;  %616 = vrot.lane.b32.xlu0 %v2872_v27, %s2239_s30  ;;  %4456 = vst [vmem:[#allocation78_spill] sm:$0xff] %v2914_v55 }
  0xba   : > { %v2882_v29 = vpop.permute.xlu2 %522 }
  0xbb   : > { %4451 = vst [vmem:[#allocation73_spill] sm:$0xff] %v2882_v29  ;;  %v2887_v62 = vpop.permute.xlu1 %502  ;;  %v2889_v15 = vpop.permute.xlu0 %500 }
  0xbc   : > { %4452 = vst [vmem:[#allocation74_spill] sm:$0xff] %v2887_v62 }
  0xc0   : > { %626 = vrot.lane.b32.xlu2 %v2892_v38, %s2239_s30 }
  0xc1   : > { %624 = vrot.lane.b32.xlu1 %v2895_v40, %s2239_s30  ;;  %622 = vrot.lane.b32.xlu0 %v2898_v51, %s2239_s30 }
  0xc2   : > { %v2906_v18 = vpop.permute.xlu2 %528 }
  0xc3   : > { %4454 = vst [vmem:[#allocation76_spill] sm:$0xff] %v2906_v18  ;;  %v2909_v29 = vpop.permute.xlu1 %508  ;;  %v2911_v57 = vpop.permute.xlu0 %506 }
  0xc4   : > { %4455 = vst [vmem:[#allocation77_spill] sm:$0xff] %v2909_v29 }
  0xc8   : > { %664 = vrot.lane.b32.xlu2 %v2334_v5, %s2240_s4 }
  0xc9   : > { %662 = vrot.lane.b32.xlu1 %v2329_v2, %s2240_s4  ;;  %628 = vrot.lane.b32.xlu0 %v2914_v55, %s2239_s30 }
  0xca   : > { %v2922_v3 = vpop.permute.xlu2 %566 }
  0xcb   : > { %4457 = vst [vmem:[#allocation79_spill] sm:$0xff] %v2922_v3  ;;  %v2924_v33 = vpop.permute.xlu1 %514  ;;  %v2926_v18 = vpop.permute.xlu0 %512 }
  0xcc   : > { %4458 = vst [vmem:[#allocation80_spill] sm:$0xff] %v2924_v33 }
  0xd0   : > { %670 = vrot.lane.b32.xlu2 %v2390_v28, %s2240_s4 }
  0xd1   : > { %668 = vrot.lane.b32.xlu1 %v2326_v1, %s2240_s4  ;;  %666 = vrot.lane.b32.xlu0 %v2323_v0, %s2240_s4 }
  0xd2   : > { %v2934_v5 = vpop.permute.xlu2 %572 }
  0xd3   : > { %4459 = vst [vmem:[#allocation81_spill] sm:$0xff] %v2934_v5  ;;  %v2936_v2 = vpop.permute.xlu1 %520  ;;  %v2938_v53 = vpop.permute.xlu0 %518 }
  0xd4   : > { %4460 = vst [vmem:[#allocation82_spill] sm:$0xff] %v2936_v2 }
  0xd8   : > { %676 = vrot.lane.b32.xlu2 %v2381_v25, %s2240_s4 }
  0xd9   : > { %674 = vrot.lane.b32.xlu1 %v2378_v24, %s2240_s4  ;;  %672 = vrot.lane.b32.xlu0 %v2384_v26, %s2240_s4 }
  0xda   : > { %v2946_v45 = vpop.permute.xlu2 %578 }
  0xdb   : > { %4461 = vst [vmem:[#allocation83_spill] sm:$0xff] %v2946_v45  ;;  %v2948_v1 = vpop.permute.xlu1 %526  ;;  %v2950_v3 = vpop.permute.xlu0 %524 }
  0xdc   : > { %4462 = vst [vmem:[#allocation84_spill] sm:$0xff] %v2948_v1 }
  0xdd   : > { %4463 = vst [vmem:[#allocation85_spill] sm:$0xff] %v2950_v3 }
  0xe0   : > { %682 = vrot.lane.b32.xlu2 %v2455_v52, %s2240_s4 }
  0xe1   : > { %680 = vrot.lane.b32.xlu1 %v2412_v37, %s2240_s4  ;;  %678 = vrot.lane.b32.xlu0 %v2418_v39, %s2240_s4 }
  0xe2   : > { %v2958_v25 = vpop.permute.xlu2 %584 }
  0xe3   : > { %4464 = vst [vmem:[#allocation86_spill] sm:$0xff] %v2958_v25  ;;  %v2960_v24 = vpop.permute.xlu1 %532  ;;  %v2962_v5 = vpop.permute.xlu0 %530 }
  0xe4   : > { %4465 = vst [vmem:[#allocation87_spill] sm:$0xff] %v2960_v24 }
  0xe5   : > { %4466 = vst [vmem:[#allocation88_spill] sm:$0xff] %v2962_v5 }
  0xe8   : > { %688 = vrot.lane.b32.xlu2 %v2446_v49, %s2240_s4 }
  0xe9   : > { %686 = vrot.lane.b32.xlu1 %v2443_v48, %s2240_s4  ;;  %684 = vrot.lane.b32.xlu0 %v2449_v50, %s2240_s4 }
  0xea   : > { %v2970_v45 = vpop.permute.xlu2 %590 }
  0xeb   : > { %4467 = vst [vmem:[#allocation89_spill] sm:$0xff] %v2970_v45  ;;  %v2972_v37 = vpop.permute.xlu1 %570  ;;  %v2974_v39 = vpop.permute.xlu0 %568 }
  0xec   : > { %4468 = vst [vmem:[#allocation90_spill] sm:$0xff] %v2972_v37 }
  0xed   : > { %4469 = vst [vmem:[#allocation91_spill] sm:$0xff] %v2974_v39 }
  0xf0   : > { %694 = vrot.lane.b32.xlu2 %v2521_v30, %s2240_s4 }
  0xf1   : > { %692 = vrot.lane.b32.xlu1 %v2478_v61, %s2240_s4  ;;  %690 = vrot.lane.b32.xlu0 %v2484_v63, %s2240_s4 }
  0xf2   : > { %v2982_v25 = vpop.permute.xlu2 %596 }
  0xf3   : > { %v2984_v24 = vpop.permute.xlu1 %576  ;;  %v2986_v1 = vpop.permute.xlu0 %574 }
  0xf4   : > { %4470 = vst [vmem:[#allocation92_spill] sm:$0xff] %v2984_v24 }
  0xf5   : > { %4471 = vst [vmem:[#allocation93_spill] sm:$0xff] %v2986_v1 }
  0xf8   : > { %700 = vrot.lane.b32.xlu2 %v2512_v20, %s2240_s4 }
  0xf9   : > { %698 = vrot.lane.b32.xlu1 %v2509_v19, %s2240_s4  ;;  %696 = vrot.lane.b32.xlu0 %v2515_v23, %s2240_s4 }
  0xfa   : > { %v2994_v45 = vpop.permute.xlu2 %602 }
  0xfb   : > { %v2996_v61 = vpop.permute.xlu1 %582  ;;  %v2998_v63 = vpop.permute.xlu0 %580 }
  0xfc   : > { %4472 = vst [vmem:[#allocation94_spill] sm:$0xff] %v2996_v61  ;;  %v3040_v61 = vld [vmem:[%s2320_s28 + $0x180] sm:$0xff] }
  0xfd   : > { %4473 = vst [vmem:[#allocation95_spill] sm:$0xff] %v2998_v63 }
 0x100   : > { %706 = vrot.lane.b32.xlu2 %v2587_v6, %s2240_s4 }
 0x101   : > { %704 = vrot.lane.b32.xlu1 %v2544_v54, %s2240_s4  ;;  %702 = vrot.lane.b32.xlu0 %v2550_v56, %s2240_s4 }
 0x102   : > { %v3006_v24 = vpop.permute.xlu2 %608 }
 0x103   : > { %v3008_v23 = vpop.permute.xlu1 %588  ;;  %v3010_v1 = vpop.permute.xlu0 %586 }
 0x104   : > { %4474 = vst [vmem:[#allocation96_spill] sm:$0xff] %v3008_v23 }
 0x105   : > { %4475 = vst [vmem:[#allocation97_spill] sm:$0xff] %v3010_v1  ;;  %v3037_v1 = vld [vmem:[%s2320_s28 + $0x188] sm:$0xff] }
 0x108   : > { %712 = vrot.lane.b32.xlu2 %v2578_v43, %s2240_s4 }
 0x109   : > { %710 = vrot.lane.b32.xlu1 %v2575_v42, %s2240_s4  ;;  %708 = vrot.lane.b32.xlu0 %v2581_v11, %s2240_s4 }
 0x10a   : > { %v3018_v54 = vpop.permute.xlu2 %614 }
 0x10b   : > { %v3020_v56 = vpop.permute.xlu1 %594  ;;  %v3022_v63 = vpop.permute.xlu0 %592 }
 0x110   : > { %718 = vrot.lane.b32.xlu2 %v2647_v34, %s2240_s4 }
 0x111   : > { %716 = vrot.lane.b32.xlu1 %v2610_v41, %s2240_s4  ;;  %714 = vrot.lane.b32.xlu0 %v2616_v17, %s2240_s4 }
 0x112   : > { %v3030_v23 = vpop.permute.xlu2 %620 }
 0x113   : > { %4476 = vst [vmem:[#allocation98_spill] sm:$0xff] %v3030_v23  ;;  %v3032_v42 = vpop.permute.xlu1 %600  ;;  %v3034_v11 = vpop.permute.xlu0 %598 }
 0x114   : > { %4477 = vst [vmem:[#allocation99_spill] sm:$0xff] %v3032_v42 }
 0x115   : > { %4478 = vst [vmem:[#allocation100_spill] sm:$0xff] %v3034_v11  ;;  %v4510_v11 = vld [vmem:[#allocation22_spill] sm:$0xff] }
 0x118   : > { %724 = vrot.lane.b32.xlu2 %v3037_v1, %s2240_s4 }
 0x119   : > { %722 = vrot.lane.b32.xlu1 %v3040_v61, %s2240_s4  ;;  %720 = vrot.lane.b32.xlu0 %v2641_v31, %s2240_s4  ;;  %s4050_s4 = sand.u32 1, %s2228_s13  }
 0x11a   : > { %v3048_v17 = vpop.permute.xlu2 %626  ;;  %s1863_s17 = scalar_lea.sflag [#allocation3], %s4050_s4 }
 0x11b   : > { %4479 = vst [vmem:[#allocation101_spill] sm:$0xff] %v3048_v17  ;;  %v3050_v41 = vpop.permute.xlu1 %606  ;;  %v3052_v37 = vpop.permute.xlu0 %604 }
 0x11c   : > { %4480 = vst [vmem:[#allocation102_spill] sm:$0xff] %v3050_v41 }
 0x11d   : > { %4481 = vst [vmem:[#allocation103_spill] sm:$0xff] %v3052_v37 }
 0x120   : > { %762 = vrot.lane.b32.xlu2 %v2350_v13, %s2241_s5 }
 0x121   : > { %760 = vrot.lane.b32.xlu1 %v2374_v22, %s2241_s5  ;;  %758 = vrot.lane.b32.xlu0 %v2361_v16, %s2241_s5 }
 0x122   : > { %v3060_v39 = vpop.permute.xlu2 %664 }
 0x123   : > { %4482 = vst [vmem:[#allocation104_spill] sm:$0xff] %v3060_v39  ;;  %v3062_v2 = vpop.permute.xlu1 %612  ;;  %v3064_v31 = vpop.permute.xlu0 %610  ;;  %v4488_v39 = vld [vmem:[#allocation11_spill] sm:$0xff] }
 0x124   : > { %4483 = vst [vmem:[#allocation105_spill] sm:$0xff] %v3062_v2 }
 0x125   : > { %4484 = vst [vmem:[#allocation106_spill] sm:$0xff] %v3064_v31  ;;  %v4489_v31 = vld [vmem:[#allocation8_spill] sm:$0xff] }
 0x128   : > { %768 = vrot.lane.b32.xlu2 %v2406_v35, %s2241_s5 }
 0x129   : > { %766 = vrot.lane.b32.xlu1 %v2409_v36, %s2241_s5  ;;  %764 = vrot.lane.b32.xlu0 %v2371_v21, %s2241_s5 }
 0x12a   : > { %v3072_v33 = vpop.permute.xlu2 %670 }
 0x12b   : > { %4485 = vst [vmem:[#allocation107_spill] sm:$0xff] %v3072_v33  ;;  %v3074_v22 = vpop.permute.xlu1 %618  ;;  %v3076_v16 = vpop.permute.xlu0 %616  ;;  %v4493_v33 = vld [vmem:[#allocation13_spill] sm:$0xff] }
 0x12c   : > { %4486 = vst [vmem:[#allocation108_spill] sm:$0xff] %v3074_v22 }
 0x12d   : > { %4487 = vst [vmem:[#allocation109_spill] sm:$0xff] %v3076_v16  ;;  %v4494_v16 = vld [vmem:[#allocation14_spill] sm:$0xff] }
 0x130   : > { %774 = vrot.lane.b32.xlu2 %v2437_v46, %s2241_s5  ;;  %v4495_v46 = vld [vmem:[#allocation9_spill] sm:$0xff] }
 0x131   : > { %772 = vrot.lane.b32.xlu1 %v4488_v39, %s2241_s5  ;;  %770 = vrot.lane.b32.xlu0 %v4489_v31, %s2241_s5 }
 0x132   : > { %v3084_v2 = vpop.permute.xlu2 %676 }
 0x133   : > { %4490 = vst [vmem:[#allocation8_spill] sm:$0xff] %v3084_v2  ;;  %v3086_v37 = vpop.permute.xlu1 %624  ;;  %v3088_v41 = vpop.permute.xlu0 %622  ;;  %v4499_v2 = vld [vmem:[#allocation16_spill] sm:$0xff] }
 0x134   : > { %4491 = vst [vmem:[#allocation110_spill] sm:$0xff] %v3086_v37  ;;  %v4501_v37 = vld [vmem:[#allocation12_spill] sm:$0xff] }
 0x135   : > { %4492 = vst [vmem:[#allocation111_spill] sm:$0xff] %v3088_v41  ;;  %v4500_v41 = vld [vmem:[#allocation17_spill] sm:$0xff] }
 0x138   : > { %780 = vrot.lane.b32.xlu2 %v4493_v33, %s2241_s5 }
 0x139   : > { %778 = vrot.lane.b32.xlu1 %v4494_v16, %s2241_s5  ;;  %776 = vrot.lane.b32.xlu0 %v4495_v46, %s2241_s5 }
 0x13a   : > { %v3096_v22 = vpop.permute.xlu2 %682 }
 0x13b   : > { %4496 = vst [vmem:[#allocation13_spill] sm:$0xff] %v3096_v22  ;;  %v3098_v39 = vpop.permute.xlu1 %662  ;;  %v3100_v17 = vpop.permute.xlu0 %628  ;;  %v4504_v22 = vld [vmem:[#allocation19_spill] sm:$0xff] }
 0x13c   : > { %4497 = vst [vmem:[#allocation14_spill] sm:$0xff] %v3098_v39  ;;  %v4505_v39 = vld [vmem:[#allocation20_spill] sm:$0xff] }
 0x13d   : > { %4498 = vst [vmem:[#allocation112_spill] sm:$0xff] %v3100_v17 }
 0x140   : > { %786 = vrot.lane.b32.xlu2 %v4499_v2, %s2241_s5  ;;  %v4506_v2 = vld [vmem:[#allocation15_spill] sm:$0xff] }
 0x141   : > { %784 = vrot.lane.b32.xlu1 %v4500_v41, %s2241_s5  ;;  %782 = vrot.lane.b32.xlu0 %v4501_v37, %s2241_s5 }
 0x142   : > { %v3108_v29 = vpop.permute.xlu2 %688 }
 0x143   : > { %v3110_v34 = vpop.permute.xlu1 %668  ;;  %v3112_v46 = vpop.permute.xlu0 %666 }
 0x144   : > { %4502 = vst [vmem:[#allocation12_spill] sm:$0xff] %v3110_v34  ;;  %v4511_v34 = vld [vmem:[#allocation23_spill] sm:$0xff] }
 0x145   : > { %4503 = vst [vmem:[#allocation113_spill] sm:$0xff] %v3112_v46 }
 0x148   : > { %792 = vrot.lane.b32.xlu2 %v4504_v22, %s2241_s5  ;;  %v4512_v22 = vld [vmem:[#allocation18_spill] sm:$0xff] }
 0x149   : > { %790 = vrot.lane.b32.xlu1 %v4505_v39, %s2241_s5  ;;  %788 = vrot.lane.b32.xlu0 %v4506_v2, %s2241_s5 }
 0x14a   : > { %v3120_v17 = vpop.permute.xlu2 %694 }
 0x14b   : > { %4507 = vst [vmem:[#allocation114_spill] sm:$0xff] %v3120_v17  ;;  %v3122_v41 = vpop.permute.xlu1 %674  ;;  %v3124_v5 = vpop.permute.xlu0 %672 }
 0x14c   : > { %4508 = vst [vmem:[#allocation115_spill] sm:$0xff] %v3122_v41  ;;  %v4516_v41 = vld [vmem:[#allocation26_spill] sm:$0xff] }
 0x14d   : > { %4509 = vst [vmem:[#allocation116_spill] sm:$0xff] %v3124_v5  ;;  %v4517_v5 = vld [vmem:[#allocation27_spill] sm:$0xff] }
 0x150   : > { %798 = vrot.lane.b32.xlu2 %v4510_v11, %s2241_s5  ;;  %v4518_v11 = vld [vmem:[#allocation21_spill] sm:$0xff] }
 0x151   : > { %796 = vrot.lane.b32.xlu1 %v4511_v34, %s2241_s5  ;;  %794 = vrot.lane.b32.xlu0 %v4512_v22, %s2241_s5 }
 0x152   : > { %v3132_v39 = vpop.permute.xlu2 %700 }
 0x153   : > { %4513 = vst [vmem:[#allocation18_spill] sm:$0xff] %v3132_v39  ;;  %v3134_v46 = vpop.permute.xlu1 %680  ;;  %v3136_v2 = vpop.permute.xlu0 %678  ;;  %v4522_v39 = vld [vmem:[#allocation29_spill] sm:$0xff] }
 0x154   : > { %4514 = vst [vmem:[#allocation117_spill] sm:$0xff] %v3134_v46 }
 0x155   : > { %4515 = vst [vmem:[#allocation118_spill] sm:$0xff] %v3136_v2 }
 0x158   : > { %804 = vrot.lane.b32.xlu2 %v4516_v41, %s2241_s5  ;;  %v4523_v41 = vld [vmem:[#allocation25_spill] sm:$0xff] }
 0x159   : > { %802 = vrot.lane.b32.xlu1 %v4517_v5, %s2241_s5  ;;  %800 = vrot.lane.b32.xlu0 %v4518_v11, %s2241_s5  ;;  %v3163_v11 = vld [vmem:[%s2320_s28 + $0x190] sm:$0x3] }
 0x15a   : > { %v3144_v17 = vpop.permute.xlu2 %706 }
 0x15b   : > { %4519 = vst [vmem:[#allocation119_spill] sm:$0xff] %v3144_v17  ;;  %v3146_v42 = vpop.permute.xlu1 %686  ;;  %v3148_v34 = vpop.permute.xlu0 %684 }
 0x15c   : > { %4520 = vst [vmem:[#allocation120_spill] sm:$0xff] %v3146_v42  ;;  %v4525_v42 = vld [vmem:[#allocation33_spill] sm:$0xff] }
 0x15d   : > { %4521 = vst [vmem:[#allocation121_spill] sm:$0xff] %v3148_v34  ;;  %v4526_v34 = vld [vmem:[#allocation28_spill] sm:$0xff] }
 0x160   : > { %810 = vrot.lane.b32.xlu2 %v4522_v39, %s2241_s5  ;;  %v450_v39 = vrot.slane %v3163_v11, 1 }
 0x161   : > { %808 = vrot.lane.b32.xlu1 %v2638_v58, %s2241_s5  ;;  %806 = vrot.lane.b32.xlu0 %v4523_v41, %s2241_s5  ;;  %v448_v41 = vrot.slane %v3037_v1, 1 }
 0x162   : > { %v3156_v46 = vpop.permute.xlu2 %712 }
 0x163   : > { %4524 = vst [vmem:[#allocation122_spill] sm:$0xff] %v3156_v46  ;;  %v3158_v5 = vpop.permute.xlu1 %692  ;;  %v3160_v2 = vpop.permute.xlu0 %690  ;;  %v447_v46 = vrot.slane %v3040_v61, 1 }
 0x168   : > { %816 = vrot.lane.b32.xlu2 %v2662_v60, %s2241_s5  ;;  %v3181_v60 = vsel %vm282_vm0, %v448_v41, %v450_v39 }
 0x169   : > { %814 = vrot.lane.b32.xlu1 %v4525_v42, %s2241_s5  ;;  %812 = vrot.lane.b32.xlu0 %v4526_v34, %s2241_s5  ;;  %4529 = vst [vmem:[#allocation125_spill] sm:$0xff] %v3181_v60  ;;  %v3184_v42 = vsel %vm282_vm0, %v447_v46, %v448_v41  ;;  %v4533_v46 = vld [vmem:[#allocation34_spill] sm:$0xff] }
 0x16a   : > { %v3171_v58 = vpop.permute.xlu2 %718  ;;  %4530 = vst [vmem:[#allocation126_spill] sm:$0xff] %v3184_v42 }
 0x16b   : > { %4527 = vst [vmem:[#allocation123_spill] sm:$0xff] %v3171_v58  ;;  %v3176_v17 = vpop.permute.xlu1 %698  ;;  %v3178_v23 = vpop.permute.xlu0 %696 }
 0x16c   : > { %4528 = vst [vmem:[#allocation124_spill] sm:$0xff] %v3178_v23 }
 0x170   : > { %854 = vrot.lane.b32.xlu2 %v2680_v10, %s2242_s6 }
 0x171   : > { %820 = vrot.lane.b32.xlu1 %v3181_v60, %s2241_s5  ;;  %818 = vrot.lane.b32.xlu0 %v3184_v42, %s2241_s5  ;;  %v4536_v60 = vld [vmem:[#allocation40_spill] sm:$0xff]  ;;  %s1996_s5 = sshll.u32 %s4050_s4, 8 }
 0x172   : > { %v3192_v34 = vpop.permute.xlu2 %724  ;;  %v4537_v42 = vld [vmem:[#allocation36_spill] sm:$0xff] }
 0x173   : > { %4531 = vst [vmem:[#allocation127_spill] sm:$0xff] %v3192_v34  ;;  %v3194_v58 = vpop.permute.xlu1 %704  ;;  %v3196_v23 = vpop.permute.xlu0 %702 }
 0x174   : > { %4532 = vst [vmem:[#allocation128_spill] sm:$0xff] %v3196_v23 }
 0x178   : > { %860 = vrot.lane.b32.xlu2 %v2699_v9, %s2242_s6 }
 0x179   : > { %858 = vrot.lane.b32.xlu1 %v2702_v47, %s2242_s6  ;;  %856 = vrot.lane.b32.xlu0 %v4533_v46, %s2242_s6 }
 0x17a   : > { %v3204_v10 = vpop.permute.xlu2 %762 }
 0x17b   : > { %4534 = vst [vmem:[#allocation34_spill] sm:$0xff] %v3204_v10  ;;  %v3206_v39 = vpop.permute.xlu1 %710  ;;  %v3208_v41 = vpop.permute.xlu0 %708  ;;  %v4540_v10 = vld [vmem:[#allocation43_spill] sm:$0xff] }
 0x17c   : > { %4535 = vst [vmem:[#allocation129_spill] sm:$0xff] %v3208_v41  ;;  %v4541_v41 = vld [vmem:[#allocation44_spill] sm:$0xff] }
 0x180   : > { %866 = vrot.lane.b32.xlu2 %v2720_v44, %s2242_s6  ;;  %v4542_v44 = vld [vmem:[#allocation38_spill] sm:$0xff] }
 0x181   : > { %864 = vrot.lane.b32.xlu1 %v4536_v60, %s2242_s6  ;;  %862 = vrot.lane.b32.xlu0 %v4537_v42, %s2242_s6 }
 0x182   : > { %v3216_v34 = vpop.permute.xlu2 %768 }
 0x183   : > { %4538 = vst [vmem:[#allocation40_spill] sm:$0xff] %v3216_v34  ;;  %v3218_v23 = vpop.permute.xlu1 %716  ;;  %v3220_v46 = vpop.permute.xlu0 %714  ;;  %v4546_v34 = vld [vmem:[#allocation42_spill] sm:$0xff] }
 0x184   : > { %4539 = vst [vmem:[#allocation36_spill] sm:$0xff] %v3220_v46 }
 0x188   : > { %872 = vrot.lane.b32.xlu2 %v4540_v10, %s2242_s6 }
 0x189   : > { %870 = vrot.lane.b32.xlu1 %v4541_v41, %s2242_s6  ;;  %868 = vrot.lane.b32.xlu0 %v4542_v44, %s2242_s6 }
 0x18a   : > { %v3228_v62 = vpop.permute.xlu2 %774 }
 0x18b   : > { %4543 = vst [vmem:[#allocation130_spill] sm:$0xff] %v3228_v62  ;;  %v3230_v43 = vpop.permute.xlu1 %722  ;;  %v3232_v3 = vpop.permute.xlu0 %720  ;;  %v4550_v62 = vld [vmem:[#allocation55_spill] sm:$0xff] }
 0x18c   : > { %4544 = vst [vmem:[#allocation131_spill] sm:$0xff] %v3230_v43 }
 0x18d   : > { %4545 = vst [vmem:[#allocation132_spill] sm:$0xff] %v3232_v3  ;;  %v4551_v3 = vld [vmem:[#allocation48_spill] sm:$0xff] }
 0x190   : > { %878 = vrot.lane.b32.xlu2 %v2767_v59, %s2242_s6 }
 0x191   : > { %876 = vrot.lane.b32.xlu1 %v2770_v4, %s2242_s6  ;;  %874 = vrot.lane.b32.xlu0 %v4546_v34, %s2242_s6 }
 0x192   : > { %v3240_v10 = vpop.permute.xlu2 %780 }
 0x193   : > { %4547 = vst [vmem:[#allocation42_spill] sm:$0xff] %v3240_v10  ;;  %v3242_v41 = vpop.permute.xlu1 %760  ;;  %v3244_v46 = vpop.permute.xlu0 %758  ;;  %v4554_v10 = vld [vmem:[#allocation53_spill] sm:$0xff] }
 0x194   : > { %4548 = vst [vmem:[#allocation133_spill] sm:$0xff] %v3242_v41 }
 0x195   : > { %4549 = vst [vmem:[#allocation134_spill] sm:$0xff] %v3244_v46 }
 0x198   : > { %884 = vrot.lane.b32.xlu2 %v2793_v32, %s2242_s6 }
 0x199   : > { %882 = vrot.lane.b32.xlu1 %v4550_v62, %s2242_s6  ;;  %880 = vrot.lane.b32.xlu0 %v4551_v3, %s2242_s6 }
 0x19a   : > { %v3252_v44 = vpop.permute.xlu2 %786 }
 0x19b   : > { %v3254_v43 = vpop.permute.xlu1 %766  ;;  %v3256_v59 = vpop.permute.xlu0 %764 }
 0x19c   : > { %4552 = vst [vmem:[#allocation135_spill] sm:$0xff] %v3254_v43  ;;  %v4557_v43 = vld [vmem:[#allocation66_spill] sm:$0xff] }
 0x19d   : > { %4553 = vst [vmem:[#allocation136_spill] sm:$0xff] %v3256_v59  ;;  %v4558_v59 = vld [vmem:[#allocation59_spill] sm:$0xff] }
 0x1a0   : > { %890 = vrot.lane.b32.xlu2 %v2818_v7, %s2242_s6 }
 0x1a1   : > { %888 = vrot.lane.b32.xlu1 %v2821_v8, %s2242_s6  ;;  %886 = vrot.lane.b32.xlu0 %v4554_v10, %s2242_s6 }
 0x1a2   : > { %v3264_v32 = vpop.permute.xlu2 %792 }
 0x1a3   : > { %v3266_v62 = vpop.permute.xlu1 %772  ;;  %v3268_v41 = vpop.permute.xlu0 %770 }
 0x1a4   : > { %4555 = vst [vmem:[#allocation137_spill] sm:$0xff] %v3266_v62  ;;  %v4561_v62 = vld [vmem:[#allocation64_spill] sm:$0xff] }
 0x1a5   : > { %4556 = vst [vmem:[#allocation138_spill] sm:$0xff] %v3268_v41 }
 0x1a8   : > { %896 = vrot.lane.b32.xlu2 %v2844_v12, %s2242_s6 }
 0x1a9   : > { %894 = vrot.lane.b32.xlu1 %v4557_v43, %s2242_s6  ;;  %892 = vrot.lane.b32.xlu0 %v4558_v59, %s2242_s6 }
 0x1aa   : > { %v3276_v46 = vpop.permute.xlu2 %798 }
 0x1ab   : > { %v3278_v8 = vpop.permute.xlu1 %778  ;;  %v3280_v10 = vpop.permute.xlu0 %776 }
 0x1ac   : > { %4559 = vst [vmem:[#allocation59_spill] sm:$0xff] %v3278_v8  ;;  %v452_v8 = vrot.slane %v3040_v61, 2  ;;  %v455_v61 = vrot.slane %v3163_v11, 2 }
 0x1ad   : > { %4560 = vst [vmem:[#allocation139_spill] sm:$0xff] %v3280_v10  ;;  %v453_v10 = vrot.slane %v3037_v1, 2 }
 0x1b0   : > { %902 = vrot.lane.b32.xlu2 %v2869_v14, %s2242_s6  ;;  %v4563_v14 = vld [vmem:[#allocation70_spill] sm:$0xff] }
 0x1b1   : > { %900 = vrot.lane.b32.xlu1 %v2872_v27, %s2242_s6  ;;  %898 = vrot.lane.b32.xlu0 %v4561_v62, %s2242_s6 }
 0x1b2   : > { %v3288_v41 = vpop.permute.xlu2 %804 }
 0x1b3   : > { %v3290_v12 = vpop.permute.xlu1 %784  ;;  %v3292_v43 = vpop.permute.xlu0 %782 }
 0x1b4   : > { %4562 = vst [vmem:[#allocation140_spill] sm:$0xff] %v3292_v43  ;;  %v3307_v43 = vsel %vm363_vm1, %v452_v8, %v453_v10  ;;  %v3321_v8 = vsel %vm363_vm1, %v453_v10, %v455_v61  ;;  %v3336_v10 = vld [vmem:[%s2320_s28 + $0x38] sm:$0xff] }
 0x1b5   : > { %4564 = vst [vmem:[#allocation141_spill] sm:$0xff] %v3307_v43 }
 0x1b6   : > { %4565 = vst [vmem:[#allocation142_spill] sm:$0xff] %v3321_v8 }
 0x1b8   : > { %908 = vrot.lane.b32.xlu2 %v2895_v40, %s2242_s6 }
 0x1b9   : > { %906 = vrot.lane.b32.xlu1 %v2898_v51, %s2242_s6  ;;  %904 = vrot.lane.b32.xlu0 %v4563_v14, %s2242_s6 }
 0x1ba   : > { %v3302_v27 = vpop.permute.xlu2 %810 }
 0x1bb   : > { %v3304_v62 = vpop.permute.xlu1 %790  ;;  %v789_v3 = vpop.permute.xlu0 %788 }
 0x1c0   : > { %914 = vrot.lane.b32.xlu2 %v3307_v43, %s2242_s6 }
 0x1c1   : > { %912 = vrot.lane.b32.xlu1 %v2914_v55, %s2242_s6  ;;  %910 = vrot.lane.b32.xlu0 %v2892_v38, %s2242_s6 }
 0x1c2   : > { %v3315_v1 = vpop.permute.xlu2 %816 }
 0x1c3   : > { %v3318_v14 = vpop.permute.xlu1 %796  ;;  %v795_v40 = vpop.permute.xlu0 %794 }
 0x1c8   : > { %1046 = vrot.lane.b32.xlu2 %v2350_v13, %s2243_s7 }
 0x1c9   : > { %950 = vrot.lane.b32.xlu1 %v2323_v0, %s2244_s8  ;;  %916 = vrot.lane.b32.xlu0 %v3321_v8, %s2242_s6  ;;  %s4064_s6 = scalar_lea.vmem [#allocation2], %s1996_s5 }
 0x1ca   : > { %v3329_v43 = vpop.permute.xlu2 %854  ;;  %s1880_s10 = sshll.u32 %s4064_s6, 4  ;;  %s1881_s10 = int_to_ptr.vmem [resolvable:$true] %s1880_s10 }
 0x1cb   : > { %v3331_v11 = vpop.permute.xlu1 %802  ;;  %v801_v55 = vpop.permute.xlu0 %800 }
 0x1d0   : > { %1048 = vrot.lane.b32.xlu2 %v2371_v21, %s2243_s7 }
 0x1d1   : > { %952 = vrot.lane.b32.xlu1 %v3336_v10, %s2244_s8  ;;  %1142 = vrot.lane.b32.xlu0 %v2702_v47, %s2245_s9 }
 0x1d2   : > { %v3342_v0 = vpop.permute.xlu2 %860 }
 0x1d3   : > { %v3344_v13 = vpop.permute.xlu1 %808  ;;  %v3346_v61 = vpop.permute.xlu0 %806 }
 0x1d8   : > { %966 = vrot.lane.b32.xlu2 %v2455_v52, %s2244_s8 }
 0x1d9   : > { %954 = vrot.lane.b32.xlu1 %v2390_v28, %s2244_s8  ;;  %1144 = vrot.lane.b32.xlu0 %v2699_v9, %s2245_s9 }
 0x1da   : > { %v3354_v21 = vpop.permute.xlu2 %866 }
 0x1db   : > { %4566 = vst [vmem:[#allocation143_spill] sm:$0xff] %v3354_v21  ;;  %v3356_v8 = vpop.permute.xlu1 %814  ;;  %v3358_v47 = vpop.permute.xlu0 %812  ;;  %v1254_v21 = vsel %vm1238_vm2, %v2446_v49, %v2889_v15 }
 0x1e0   : > { %1146 = vrot.lane.b32.xlu2 %v4537_v42, %s2245_s9 }
 0x1e1   : > { %1062 = vrot.lane.b32.xlu1 %v4494_v16, %s2243_s7  ;;  %1050 = vrot.lane.b32.xlu0 %v2409_v36, %s2243_s7 }
 0x1e2   : > { %v3366_v52 = vpop.permute.xlu2 %872 }
 0x1e3   : > { %v3368_v28 = vpop.permute.xlu1 %820  ;;  %v3370_v9 = vpop.permute.xlu0 %818 }
 0x1e8   : > { %968 = vrot.lane.b32.xlu2 %v2449_v50, %s2244_s8  ;;  %v1287_v50 = vsel %vm1271_vm3, %v1254_v21, %v2982_v25 }
 0x1e9   : > { %956 = vrot.lane.b32.xlu1 %v2384_v26, %s2244_s8  ;;  %1158 = vrot.lane.b32.xlu0 %v4546_v34, %s2245_s9  ;;  %v1320_v26 = vsel %vm1304_vm4, %v1287_v50, %v3158_v5  ;;  %v1257_v5 = vsel %vm1238_vm2, %v2521_v30, %v2911_v57 }
 0x1ea   : > { %v3378_v42 = vpop.permute.xlu2 %878  ;;  %v1353_v34 = vsel %vm1337_vm5, %v1320_v26, %v789_v3  ;;  %v2111_v26 = vld [vmem:[%s2320_s28 + $0xa8] sm:$0xff] }
 0x1eb   : > { %v3380_v16 = vpop.permute.xlu1 %858  ;;  %v3382_v36 = vpop.permute.xlu0 %856 }
 0x1f0   : > { %982 = vrot.lane.b32.xlu2 %v2509_v19, %s2244_s8 }
 0x1f1   : > { %1064 = vrot.lane.b32.xlu1 %v4493_v33, %s2243_s7  ;;  %1052 = vrot.lane.b32.xlu0 %v2406_v35, %s2243_s7  ;;  %v1290_v33 = vsel %vm1271_vm3, %v1257_v5, %v2994_v45  ;;  %v1260_v45 = vsel %vm1238_vm2, %v2512_v20, %v2926_v18  ;;  %v2112_v5 = vld [vmem:[%s2320_s28 + $0x98] sm:$0xff] }
 0x1f2   : > { %v885_v49 = vpop.permute.xlu2 %884  ;;  %v1323_v35 = vsel %vm1304_vm4, %v1290_v33, %v3176_v17 }
 0x1f3   : > { %v3398_v15 = vpop.permute.xlu1 %864  ;;  %v3401_v25 = vsel %vm1370_vm6, %v1353_v34, %v885_v49  ;;  %v3403_v19 = vpop.permute.xlu0 %862  ;;  %v1356_v3 = vsel %vm1337_vm5, %v1323_v35, %v795_v40  ;;  %v3436_v40 = vld [vmem:[%s2320_s28 + $0x60] sm:$0xff]  ;;  %v4567_v34 = vld [vmem:[#allocation50_spill] sm:$0xff] }
 0x1f4   : > { %v1253_v49 = vsel %vm1238_vm2, %v2111_v26, %v4567_v34  ;;  %v4573_v26 = vld [vmem:[#allocation98_spill] sm:$0xff] }
 0x1f5   : > { %v1286_v35 = vsel %vm1271_vm3, %v1253_v49, %v3020_v56  ;;  %v4574_v49 = vld [vmem:[#allocation23_spill] sm:$0xff] }
 0x1f8   : > { %1078 = vrot.lane.b32.xlu2 %v4512_v22, %s2243_s7 }
 0x1f9   : > { %1160 = vrot.lane.b32.xlu1 %v2770_v4, %s2245_s9  ;;  %1148 = vrot.lane.b32.xlu0 %v4536_v60, %s2245_s9  ;;  %v1293_v4 = vsel %vm1271_vm3, %v1260_v45, %v3006_v24  ;;  %v4569_v45 = vld [vmem:[#allocation85_spill] sm:$0xff] }
 0x1fa   : > { %v891_v21 = vpop.permute.xlu2 %890  ;;  %v1326_v60 = vsel %vm1304_vm4, %v1293_v4, %v3194_v58  ;;  %v1263_v58 = vsel %vm1238_vm2, %v2587_v6, %v2938_v53 }
 0x1fb   : > { %v3419_v50 = vpop.permute.xlu1 %870  ;;  %v3422_v30 = vsel %vm1370_vm6, %v1356_v3, %v891_v21  ;;  %v3424_v57 = vpop.permute.xlu0 %868  ;;  %v1359_v17 = vsel %vm1337_vm5, %v1326_v60, %v801_v55  ;;  %v1296_v33 = vsel %vm1271_vm3, %v1263_v58, %v3018_v54  ;;  %v1319_v54 = vsel %vm1304_vm4, %v1286_v35, %v3160_v2  ;;  %v3496_v60 = vld [vmem:[%s2320_s28 + $0xc8] sm:$0xff] }
 0x1fc   : > { %v1329_v53 = vsel %vm1304_vm4, %v1296_v33, %v3206_v39  ;;  %v1352_v39 = vsel %vm1337_vm5, %v1319_v54, %v3252_v44  ;;  %v4571_v44 = vld [vmem:[#allocation56_spill] sm:$0xff] }
 0x200   : > { %970 = vrot.lane.b32.xlu2 %v2443_v48, %s2244_s8 }
 0x201   : > { %958 = vrot.lane.b32.xlu1 %v3436_v40, %s2244_s8  ;;  %1174 = vrot.lane.b32.xlu0 %v2818_v7, %s2245_s9  ;;  %v4568_v7 = vld [vmem:[#allocation68_spill] sm:$0xff] }
 0x202   : > { %v897_v18 = vpop.permute.xlu2 %896  ;;  %v1252_v55 = vsel %vm1238_vm2, %v2112_v5, %v4568_v7  ;;  %v4575_v5 = vld [vmem:[#allocation99_spill] sm:$0xff] }
 0x203   : > { %v3443_v22 = vpop.permute.xlu1 %876  ;;  %v3446_v24 = vsel %vm1370_vm6, %v1359_v17, %v897_v18  ;;  %v3448_v48 = vpop.permute.xlu0 %874  ;;  %v1285_v6 = vsel %vm1271_vm3, %v1252_v55, %v3022_v63  ;;  %v1362_v63 = vsel %vm1337_vm5, %v1329_v53, %v3346_v61  ;;  %v4570_v61 = vld [vmem:[#allocation24_spill] sm:$0xff]  ;;  %v4572_v18 = vld [vmem:[#allocation74_spill] sm:$0xff]  ;;  %v4578_v53 = vld [vmem:[#allocation39_spill] sm:$0xff] }
 0x204   : > { %v1266_v4 = vsel %vm1238_vm2, %v4570_v61, %v4569_v45  ;;  %v3502_v17 = vld [vmem:[%s2320_s28 + $0xc0] sm:$0xff] }
 0x205   : > { %v1255_v58 = vsel %vm1238_vm2, %v3502_v17, %v4572_v18  ;;  %v1299_v34 = vsel %vm1271_vm3, %v1266_v4, %v4573_v26  ;;  %v4576_v55 = vld [vmem:[#allocation100_spill] sm:$0xff] }
 0x206   : > { %v1288_v33 = vsel %vm1271_vm3, %v1255_v58, %v4576_v55  ;;  %v1332_v35 = vsel %vm1304_vm4, %v1299_v34, %v3218_v23  ;;  %v4583_v58 = vld [vmem:[#allocation61_spill] sm:$0xff]  ;;  %v3547_v26 = vld [vmem:[%s2320_s28 + $0xe0] sm:$0xff] }
 0x207   : > { %v4584_v34 = vld [vmem:[#allocation77_spill] sm:$0xff] }
 0x208   : > { %984 = vrot.lane.b32.xlu2 %v2512_v20, %s2244_s8  ;;  %v1318_v20 = vsel %vm1304_vm4, %v1285_v6, %v3108_v29  ;;  %v4577_v6 = vld [vmem:[#allocation49_spill] sm:$0xff] }
 0x209   : > { %1066 = vrot.lane.b32.xlu1 %v4501_v37, %s2243_s7  ;;  %1054 = vrot.lane.b32.xlu0 %v4489_v31, %s2243_s7  ;;  %v1351_v37 = vsel %vm1337_vm5, %v1318_v20, %v3290_v12  ;;  %v1256_v12 = vsel %vm1238_vm2, %v3496_v60, %v4571_v44  ;;  %v4579_v20 = vld [vmem:[#allocation114_spill] sm:$0xff] }
 0x20a   : > { %v903_v56 = vpop.permute.xlu2 %902  ;;  %v1289_v7 = vsel %vm1271_vm3, %v1256_v12, %v4575_v5  ;;  %v1321_v54 = vsel %vm1304_vm4, %v1288_v33, %v4579_v20  ;;  %v4582_v12 = vld [vmem:[#allocation31_spill] sm:$0xff]  ;;  %v4585_v5 = vld [vmem:[#allocation101_spill] sm:$0xff]  ;;  %v4586_v33 = vld [vmem:[#allocation102_spill] sm:$0xff] }
 0x20b   : > { %v883_v3 = vpop.permute.xlu1 %882  ;;  %v3484_v21 = vsel %vm1370_vm6, %v1362_v63, %v903_v56  ;;  %v881_v31 = vpop.permute.xlu0 %880  ;;  %v4580_v63 = vld [vmem:[#allocation124_spill] sm:$0xff]  ;;  %v2117_v55 = vld [vmem:[%s2320_s28 + $0xb0] sm:$0xff]  ;;  %v4588_v20 = vld [vmem:[#allocation131_spill] sm:$0xff] }
 0x20c   : > { %v3487_v29 = vsel %vm1370_vm6, %v1352_v39, %v883_v3  ;;  %v3490_v2 = vsel %vm1370_vm6, %v1351_v37, %v881_v31  ;;  %v1322_v56 = vsel %vm1304_vm4, %v1289_v7, %v4580_v63  ;;  %v1365_v39 = vsel %vm1337_vm5, %v1332_v35, %v3358_v47  ;;  %v4581_v47 = vld [vmem:[#allocation88_spill] sm:$0xff] }
 0x20d   : > { %v1355_v23 = vsel %vm1337_vm5, %v1322_v56, %v3264_v32  ;;  %v1354_v3 = vsel %vm1337_vm5, %v1321_v54, %v3304_v62  ;;  %v1269_v18 = vsel %vm1238_vm2, %v4582_v12, %v4581_v47  ;;  %v2115_v32 = vld [vmem:[%s2320_s28 + $0xf0] sm:$0xff]  ;;  %v3563_v63 = vld [vmem:[%s2320_s28 + $0x68] sm:$0xff] }
 0x20e   : > { %v1259_v62 = vsel %vm1238_vm2, %v2115_v32, %v4583_v58  ;;  %v1302_v7 = vsel %vm1271_vm3, %v1269_v18, %v4585_v5  ;;  %v4589_v56 = vld [vmem:[#allocation18_spill] sm:$0xff]  ;;  %v1506_v32 = vld [vmem:[%s4294_s1 + $0x20] sm:$0xf]  ;;  %v2120_v5 = vld [vmem:[%s2320_s28 + $0x108] sm:$0xff] }
 0x20f   : > { %v1292_v35 = vsel %vm1271_vm3, %v1259_v62, %v4586_v33  ;;  %v1335_v54 = vsel %vm1304_vm4, %v1302_v7, %v4588_v20  ;;  %1999 = vmatpush.msk.msra.mxu0 %vm1604_vm7, %v1506_v32  ;;  %2040 = vmatpush.msk.msra.mxu1 %vm1604_vm7, %v1506_v32  ;;  %v1504_v58 = vld [vmem:[%s4294_s1 + $0x10] sm:$0xff]  ;;  %v4592_v7 = vld [vmem:[#allocation80_spill] sm:$0xff] }
 0x210   : > { %1080 = vrot.lane.b32.xlu2 %v4574_v49, %s2243_s7  ;;  %v1258_v49 = vsel %vm1238_vm2, %v3547_v26, %v4584_v34  ;;  %2041 = vmatpush.msk.msra.mxu2 %vm1604_vm7, %v1506_v32  ;;  %v3598_v62 = vld [vmem:[%s2320_s28 + $0x110] sm:$0xff]  ;;  %v4591_v34 = vld [vmem:[#allocation67_spill] sm:$0xff] }
 0x211   : > { %1162 = vrot.lane.b32.xlu1 %v4577_v6, %s2245_s9  ;;  %1150 = vrot.lane.b32.xlu0 %v4578_v53, %s2245_s9  ;;  %v4587_v6 = vld [vmem:[#allocation103_spill] sm:$0xff]  ;;  %v4593_v33 = vld [vmem:[#allocation105_spill] sm:$0xff] }
 0x212   : > { %v909_v37 = vpop.permute.xlu2 %908  ;;  %v1291_v53 = vsel %vm1271_vm3, %v1258_v49, %v4587_v6  ;;  %2042 = vmatpush.msk.msra.mxu3 %vm1604_vm7, %v1506_v32  ;;  %v1262_v49 = vsel %vm1238_vm2, %v3598_v62, %v4591_v34  ;;  %v4594_v6 = vld [vmem:[#allocation106_spill] sm:$0xff]  ;;  %v4595_v20 = vld [vmem:[#allocation17_spill] sm:$0xff]  ;;  %v1502_v32 = vld [vmem:[%s4294_s1] sm:$0xff] }
 0x213   : > { %v889_v31 = vpop.permute.xlu1 %888  ;;  %v3532_v45 = vsel %vm1370_vm6, %v1365_v39, %v909_v37  ;;  %v887_v61 = vpop.permute.xlu0 %886  ;;  %v1324_v39 = vsel %vm1304_vm4, %v1291_v53, %v4589_v56  ;;  %v4590_v37 = vld [vmem:[#allocation128_spill] sm:$0xff] }
 0x214   : > { %v3535_v4 = vsel %vm1370_vm6, %v1355_v23, %v889_v31  ;;  %v3538_v44 = vsel %vm1370_vm6, %v1354_v3, %v887_v61  ;;  %v1325_v23 = vsel %vm1304_vm4, %v1292_v35, %v4590_v37  ;;  %v1368_v3 = vsel %vm1337_vm5, %v1335_v54, %v3370_v9  ;;  %v4596_v54 = vld [vmem:[#allocation11_spill] sm:$0xff]  ;;  %v1503_v56 = vld [vmem:[%s4294_s1 + $0x8] sm:$0xff] }
 0x215   : > { %v1358_v61 = vsel %vm1337_vm5, %v1325_v23, %v3276_v46  ;;  %v1357_v47 = vsel %vm1337_vm5, %v1324_v39, %v3318_v14  ;;  %v1505_v14 = vld [vmem:[%s4294_s1 + $0x18] sm:$0xff]  ;;  %v1295_v35 = vsel %vm1271_vm3, %v1262_v49, %v4593_v33  ;;  %v4598_v23 = vld [vmem:[#allocation129_spill] sm:$0xff]  ;;  %v4602_v33 = vld [vmem:[#allocation108_spill] sm:$0xff] }
 0x216   : > { %1620 = vmatpush.msra.mxu0 %v1505_v14  ;;  %2043 = vmatpush.msra.mxu1 %v1505_v14  ;;  %v4597_v39 = vld [vmem:[#allocation119_spill] sm:$0xff]  ;;  %v3644_v49 = vld [vmem:[%s2320_s28 + $0x128] sm:$0xff] }
 0x217   : > { %2044 = vmatpush.msra.mxu2 %v1505_v14  ;;  %2045 = vmatpush.msra.mxu3 %v1505_v14 }
 0x218   : > { %972 = vrot.lane.b32.xlu2 %v2117_v55, %s2244_s8  ;;  %v1261_v55 = vsel %vm1238_vm2, %v2120_v5, %v4592_v7  ;;  %1621 = vmatpush.msra.mxu0 %v1504_v58 }
 0x219   : > { %960 = vrot.lane.b32.xlu1 %v3563_v63, %s2244_s8  ;;  %1176 = vrot.lane.b32.xlu0 %v4558_v59, %s2245_s9  ;;  %v1294_v53 = vsel %vm1271_vm3, %v1261_v55, %v4594_v6  ;;  %v4601_v55 = vld [vmem:[#allocation48_spill] sm:$0xff]  ;;  %v4603_v6 = vld [vmem:[#allocation109_spill] sm:$0xff] }
 0x21a   : > { %v915_v31 = vpop.permute.xlu2 %914  ;;  %v1327_v37 = vsel %vm1304_vm4, %v1294_v53, %v4597_v39  ;;  %1622 = vmatpush.msra.mxu0 %v1503_v56  ;;  %2046 = vmatpush.msra.mxu1 %v1504_v58 }
 0x21b   : > { %v895_v12 = vpop.permute.xlu1 %894  ;;  %v3580_v18 = vsel %vm1370_vm6, %v1368_v3, %v915_v31  ;;  %v893_v59 = vpop.permute.xlu0 %892  ;;  %v1328_v3 = vsel %vm1304_vm4, %v1295_v35, %v4598_v23  ;;  %2047 = vmatpush.msra.mxu2 %v1504_v58  ;;  %2048 = vmatpush.msra.mxu3 %v1504_v58 }
 0x21c   : > { %v3586_v9 = vsel %vm1370_vm6, %v1358_v61, %v895_v12  ;;  %v3589_v46 = vsel %vm1370_vm6, %v1357_v47, %v893_v59  ;;  %v1361_v61 = vsel %vm1337_vm5, %v1328_v3, %v3288_v41  ;;  %v1360_v47 = vsel %vm1337_vm5, %v1327_v37, %v3331_v11  ;;  %1623 = vmatpush.msra.mxu0 %v1502_v32  ;;  %v3638_v41 = vld [vmem:[%s2320_s28 + $0x138] sm:$0xff]  ;;  %v4599_v11 = vld [vmem:[#allocation73_spill] sm:$0xff]  ;;  %v4606_v37 = vld [vmem:[#allocation36_spill] sm:$0xff] }
 0x21d   : > { %2049 = vmatpush.msra.mxu1 %v1503_v56  ;;  %2050 = vmatpush.msra.mxu2 %v1503_v56  ;;  %v1265_v58 = vsel %vm1238_vm2, %v3638_v41, %v4599_v11 }
 0x21e   : > { %2051 = vmatpush.msra.mxu3 %v1503_v56  ;;  %v1298_v35 = vsel %vm1271_vm3, %v1265_v58, %v4602_v33  ;;  %v4605_v56 = vld [vmem:[#allocation122_spill] sm:$0xff] }
 0x21f   : > { %2052 = vmatpush.msra.mxu1 %v1502_v32  ;;  %2053 = vmatpush.msra.mxu2 %v1502_v32  ;;  %v1331_v23 = vsel %vm1304_vm4, %v1298_v35, %v4606_v37  ;;  %v2124_v58 = vld [vmem:[%s2320_s28 + $0x158] sm:$0xff] }
 0x220   : > { %986 = vrot.lane.b32.xlu2 %v2120_v5, %s2244_s8  ;;  %2054 = vmatpush.msra.mxu3 %v1502_v32  ;;  %v4600_v5 = vld [vmem:[#allocation82_spill] sm:$0xff] }
 0x221   : > { %1068 = vrot.lane.b32.xlu1 %v4595_v20, %s2243_s7  ;;  %1056 = vrot.lane.b32.xlu0 %v4596_v54, %s2243_s7  ;;  %v1264_v7 = vsel %vm1238_vm2, %v3644_v49, %v4600_v5  ;;  %v4604_v20 = vld [vmem:[#allocation38_spill] sm:$0xff]  ;;  %v4607_v5 = vld [vmem:[#allocation76_spill] sm:$0xff] }
 0x222   : > { %v3622_v31 = vpop.permute.xlu2 %1046  ;;  %v1297_v53 = vsel %vm1271_vm3, %v1264_v7, %v4603_v6  ;;  %v2123_v54 = vld [vmem:[%s2320_s28 + $0x150] sm:$0xff]  ;;  %v1268_v7 = vsel %vm1238_vm2, %v2124_v58, %v4607_v5  ;;  %v4611_v6 = vld [vmem:[#allocation111_spill] sm:$0xff] }
 0x223   : > { %v901_v12 = vpop.permute.xlu1 %900  ;;  %v899_v59 = vpop.permute.xlu0 %898  ;;  %v1330_v39 = vsel %vm1304_vm4, %v1297_v53, %v4605_v56  ;;  %v4613_v56 = vld [vmem:[#allocation22_spill] sm:$0xff] }
 0x224   : > { %v3632_v14 = vsel %vm1370_vm6, %v1361_v61, %v901_v12  ;;  %v3635_v34 = vsel %vm1370_vm6, %v1360_v47, %v899_v59  ;;  %v1364_v61 = vsel %vm1337_vm5, %v1331_v23, %v3302_v27  ;;  %v1363_v47 = vsel %vm1337_vm5, %v1330_v39, %v3344_v13  ;;  %v4609_v27 = vld [vmem:[#allocation66_spill] sm:$0xff]  ;;  %v4614_v39 = vld [vmem:[#allocation123_spill] sm:$0xff] }
 0x225   : > { %v4610_v13 = vld [vmem:[#allocation110_spill] sm:$0xff] }
 0x226   : > { %v1301_v35 = vsel %vm1271_vm3, %v1268_v7, %v4610_v13 }
 0x228   : > { %1164 = vrot.lane.b32.xlu2 %v4601_v55, %s2245_s9  ;;  %v4608_v55 = vld [vmem:[#allocation84_spill] sm:$0xff] }
 0x229   : > { %1152 = vrot.lane.b32.xlu1 %v4604_v20, %s2245_s9  ;;  %998 = vrot.lane.b32.xlu0 %v2123_v54, %s2244_s8  ;;  %v1267_v33 = vsel %vm1238_vm2, %v2123_v54, %v4608_v55  ;;  %v4612_v20 = vld [vmem:[#allocation29_spill] sm:$0xff]  ;;  %v4615_v54 = vld [vmem:[#allocation132_spill] sm:$0xff] }
 0x22a   : > { %v3663_v3 = vpop.permute.xlu2 %1048  ;;  %v1300_v53 = vsel %vm1271_vm3, %v1267_v33, %v4611_v6  ;;  %v1334_v23 = vsel %vm1304_vm4, %v1301_v35, %v4615_v54  ;;  %v3707_v33 = vld [vmem:[%s2320_s28 + $0x170] sm:$0xff]  ;;  %v3717_v35 = vld [vmem:[%s2320_s28 + $0x78] sm:$0xff] }
 0x22b   : > { %v907_v12 = vpop.permute.xlu1 %906  ;;  %v905_v59 = vpop.permute.xlu0 %904  ;;  %v1333_v37 = vsel %vm1304_vm4, %v1300_v53, %v4614_v39  ;;  %v4618_v6 = vld [vmem:[#allocation127_spill] sm:$0xff] }
 0x22c   : > { %v3670_v32 = vsel %vm1370_vm6, %v1364_v61, %v907_v12  ;;  %v3673_v11 = vsel %vm1370_vm6, %v1363_v47, %v905_v59  ;;  %v1367_v47 = vsel %vm1337_vm5, %v1334_v23, %v3315_v1  ;;  %v1366_v12 = vsel %vm1337_vm5, %v1333_v37, %v3356_v8  ;;  %v4617_v1 = vld [vmem:[#allocation112_spill] sm:$0xff]  ;;  %v4619_v39 = vld [vmem:[#allocation47_spill] sm:$0xff] }
 0x230   : > { %1178 = vrot.lane.b32.xlu2 %v4609_v27, %s2245_s9  ;;  %v4616_v27 = vld [vmem:[#allocation87_spill] sm:$0xff] }
 0x231   : > { %1094 = vrot.lane.b32.xlu1 %v4612_v20, %s2243_s7  ;;  %1082 = vrot.lane.b32.xlu0 %v4613_v56, %s2243_s7  ;;  %v1270_v13 = vsel %vm1238_vm2, %v3707_v33, %v4616_v27  ;;  %v2127_v56 = vld [vmem:[%s2320_s28] sm:$0xff]  ;;  %v4622_v27 = vld [vmem:[#allocation134_spill] sm:$0xff] }
 0x232   : > { %v3694_v61 = vpop.permute.xlu2 %966  ;;  %v1303_v8 = vsel %vm1271_vm3, %v1270_v13, %v4617_v1  ;;  %v1239_v37 = vsel %vm1238_vm2, %v2127_v56, %v4619_v39  ;;  %v2128_v56 = vld [vmem:[%s2320_s28 + $0x8] sm:$0xff] }
 0x233   : > { %v913_v59 = vpop.permute.xlu1 %912  ;;  %v911_v5 = vpop.permute.xlu0 %910  ;;  %v1336_v53 = vsel %vm1304_vm4, %v1303_v8, %v4618_v6  ;;  %v4623_v8 = vld [vmem:[#allocation16_spill] sm:$0xff]  ;;  %v4624_v6 = vld [vmem:[#allocation10_spill] sm:$0xff] }
 0x234   : > { %v3701_v7 = vsel %vm1370_vm6, %v1367_v47, %v913_v59  ;;  %v3704_v55 = vsel %vm1370_vm6, %v1366_v12, %v911_v5  ;;  %v4620_v47 = vld [vmem:[#allocation79_spill] sm:$0xff]  ;;  %v4625_v39 = vld [vmem:[#allocation52_spill] sm:$0xff] }
 0x235   : > { %v1272_v12 = vsel %vm1271_vm3, %v1239_v37, %v4620_v47 }
 0x238   : > { %974 = vrot.lane.b32.xlu2 %v3502_v17, %s2244_s8  ;;  %v1369_v17 = vsel %vm1337_vm5, %v1336_v53, %v3368_v28 }
 0x239   : > { %962 = vrot.lane.b32.xlu1 %v3717_v35, %s2244_s8  ;;  %1190 = vrot.lane.b32.xlu0 %v2898_v51, %s2245_s9  ;;  %v4621_v51 = vld [vmem:[#allocation14_spill] sm:$0xff] }
 0x23a   : > { %v1147_v20 = vpop.permute.xlu2 %1146  ;;  %v1305_v5 = vsel %vm1304_vm4, %v1272_v12, %v4621_v51  ;;  %v4627_v12 = vld [vmem:[#allocation104_spill] sm:$0xff] }
 0x23b   : > { %v951_v54 = vpop.permute.xlu1 %950  ;;  %v917_v23 = vpop.permute.xlu0 %916  ;;  %v1338_v13 = vsel %vm1337_vm5, %v1305_v5, %v4622_v27  ;;  %v4628_v5 = vld [vmem:[#allocation133_spill] sm:$0xff] }
 0x23c   : > { %v3733_v59 = vsel %vm1370_vm6, %v1369_v17, %v917_v23  ;;  %v1371_v1 = vsel %vm1370_vm6, %v1338_v13, %v3329_v43  ;;  %v1240_v43 = vsel %vm1238_vm2, %v2128_v56, %v4625_v39 }
 0x23d   : > { %v1404_v28 = vsel %vm1403_vm8, %v1371_v1, %v951_v54  ;;  %v4626_v54 = vld [vmem:[#allocation91_spill] sm:$0xff] }
 0x23e   : > { %v1273_v23 = vsel %vm1271_vm3, %v1240_v43, %v4626_v54 }
 0x23f   : > { %v1306_v51 = vsel %vm1304_vm4, %v1273_v23, %v4627_v12  ;;  %v4633_v23 = vld [vmem:[#allocation113_spill] sm:$0xff]  ;;  %v4635_v12 = vld [vmem:[#allocation34_spill] sm:$0xff] }
 0x240   : > { %988 = vrot.lane.b32.xlu2 %v3598_v62, %s2244_s8  ;;  %v1437_v62 = vsel %vm1436_vm9, %v1404_v28, %v3622_v31  ;;  %v1339_v27 = vsel %vm1337_vm5, %v1306_v51, %v4628_v5  ;;  %v4629_v31 = vld [vmem:[#allocation55_spill] sm:$0xff]  ;;  %v4630_v28 = vld [vmem:[#allocation44_spill] sm:$0xff]  ;;  %v4637_v5 = vld [vmem:[#allocation21_spill] sm:$0xff] }
 0x241   : > { %1070 = vrot.lane.b32.xlu1 %v4623_v8, %s2243_s7  ;;  %1058 = vrot.lane.b32.xlu0 %v4624_v6, %s2243_s7  ;;  %v1372_v13 = vsel %vm1370_vm6, %v1339_v27, %v3382_v36  ;;  %v2129_v36 = vld [vmem:[%s2320_s28 + $0x18] sm:$0xff]  ;;  %v4636_v51 = vld [vmem:[#allocation28_spill] sm:$0xff] }
 0x242   : > { %v3748_v53 = vpop.permute.xlu2 %968 }
 0x243   : > { %v953_v37 = vpop.permute.xlu1 %952  ;;  %v1143_v17 = vpop.permute.xlu0 %1142 }
 0x244   : > { %v1470_v47 = vsel %vm1469_vm10, %v1437_v62, %v1143_v17  ;;  %v1405_v1 = vsel %vm1403_vm8, %v1372_v13, %v953_v37  ;;  %v4631_v37 = vld [vmem:[#allocation46_spill] sm:$0xff] }
 0x245   : > { %2000 = vmatmul.msk.f32.vlgmr.msra.gmra.mxu0 %vm1507_vm11, %v1470_v47  ;;  %v1438_v39 = vsel %vm1436_vm9, %v1405_v1, %v3663_v3  ;;  %v1241_v17 = vsel %vm1238_vm2, %v2129_v36, %v4631_v37  ;;  %v4632_v62 = vld [vmem:[#allocation90_spill] sm:$0xff]  ;;  %v4634_v47 = vld [vmem:[#allocation65_spill] sm:$0xff] }
 0x246   : > { %v1274_v54 = vsel %vm1271_vm3, %v1241_v17, %v4632_v62  ;;  %v4639_v37 = vld [vmem:[#allocation94_spill] sm:$0xff] }
 0x248   : > { %1166 = vrot.lane.b32.xlu2 %v4629_v31, %s2245_s9 }
 0x249   : > { %1154 = vrot.lane.b32.xlu1 %v4630_v28, %s2245_s9  ;;  %1000 = vrot.lane.b32.xlu0 %v2124_v58, %s2244_s8  ;;  %v1307_v58 = vsel %vm1304_vm4, %v1274_v54, %v4633_v23  ;;  %v3812_v23 = vld [vmem:[%s2320_s28 + $0x80] sm:$0xff] }
 0x24a   : > { %v3771_v8 = vpop.permute.xlu2 %982  ;;  %v1340_v3 = vsel %vm1337_vm5, %v1307_v58, %v4635_v12 }
 0x24b   : > { %v955_v6 = vpop.permute.xlu1 %954  ;;  %v1145_v56 = vpop.permute.xlu0 %1144  ;;  %v1373_v27 = vsel %vm1370_vm6, %v1340_v3, %v3380_v16  ;;  %v4640_v16 = vld [vmem:[#allocation118_spill] sm:$0xff] }
 0x24c   : > { %v1471_v43 = vsel %vm1469_vm10, %v1438_v39, %v1145_v56  ;;  %v1406_v1 = vsel %vm1403_vm8, %v1373_v27, %v955_v6  ;;  %v4638_v39 = vld [vmem:[#allocation41_spill] sm:$0xff]  ;;  %v4641_v6 = vld [vmem:[#allocation130_spill] sm:$0xff] }
 0x24d   : > { %2001 = vmatmul.msk.f32.gmra.mxu0 %vm1507_vm11, %v1471_v43  ;;  %v1247_v43 = vsel %vm1238_vm2, %v3436_v40, %v4638_v39  ;;  %v4644_v27 = vld [vmem:[#allocation9_spill] sm:$0xff] }
 0x24e   : > { %v1280_v17 = vsel %vm1271_vm3, %v1247_v43, %v4639_v37  ;;  %v4646_v43 = vld [vmem:[#allocation63_spill] sm:$0xff]  ;;  %v4647_v37 = vld [vmem:[#allocation81_spill] sm:$0xff] }
 0x24f   : > { %v1313_v62 = vsel %vm1304_vm4, %v1280_v17, %v4640_v16  ;;  %v4648_v16 = vld [vmem:[#allocation86_spill] sm:$0xff] }
 0x250   : > { %1180 = vrot.lane.b32.xlu2 %v4634_v47, %s2245_s9  ;;  %v1346_v54 = vsel %vm1337_vm5, %v1313_v62, %v4641_v6  ;;  %v4649_v6 = vld [vmem:[#allocation12_spill] sm:$0xff] }
 0x251   : > { %1096 = vrot.lane.b32.xlu1 %v4636_v51, %s2243_s7  ;;  %1084 = vrot.lane.b32.xlu0 %v4637_v5, %s2243_s7  ;;  %v1379_v40 = vsel %vm1370_vm6, %v1346_v54, %v3419_v50  ;;  %v2131_v51 = vld [vmem:[%s2320_s28 + $0x120] sm:$0xff] }
 0x252   : > { %v1079_v13 = vpop.permute.xlu2 %1078  ;;  %v1412_v58 = vsel %vm1403_vm8, %v1379_v40, %v3694_v61  ;;  %v4643_v5 = vld [vmem:[#allocation15_spill] sm:$0xff]  ;;  %v4650_v40 = vld [vmem:[#allocation117_spill] sm:$0xff] }
 0x253   : > { %v1063_v31 = vpop.permute.xlu1 %1062  ;;  %v1051_v28 = vpop.permute.xlu0 %1050 }
 0x254   : > { %v1439_v56 = vsel %vm1436_vm9, %v1406_v1, %v1051_v28  ;;  %v1445_v12 = vsel %vm1436_vm9, %v1412_v58, %v1063_v31  ;;  %v2132_v28 = vld [vmem:[%s2320_s28 + $0x20] sm:$0xff] }
 0x255   : > { %v1472_v36 = vsel %vm1469_vm10, %v1439_v56, %v1147_v20  ;;  %v4642_v20 = vld [vmem:[#allocation75_spill] sm:$0xff]  ;;  %v4651_v58 = vld [vmem:[#allocation136_spill] sm:$0xff] }
 0x256   : > { %2002 = vmatmul.msk.f32.gmra.mxu0 %vm1507_vm11, %v1472_v36  ;;  %v4645_v56 = vld [vmem:[#allocation51_spill] sm:$0xff]  ;;  %v1248_v36 = vsel %vm1238_vm2, %v3563_v63, %v4646_v43  ;;  %v4653_v63 = vld [vmem:[#allocation54_spill] sm:$0xff] }
 0x257   : > { %v1242_v39 = vsel %vm1238_vm2, %v2132_v28, %v4645_v56  ;;  %v1281_v62 = vsel %vm1271_vm3, %v1248_v36, %v4648_v16  ;;  %v2133_v28 = vld [vmem:[%s2320_s28 + $0x168] sm:$0xff] }
 0x258   : > { %976 = vrot.lane.b32.xlu2 %v3496_v60, %s2244_s8  ;;  %v1275_v17 = vsel %vm1271_vm3, %v1242_v39, %v4647_v37 }
 0x259   : > { %964 = vrot.lane.b32.xlu1 %v3812_v23, %s2244_s8  ;;  %1192 = vrot.lane.b32.xlu0 %v4642_v20, %s2245_s9  ;;  %v1308_v54 = vsel %vm1304_vm4, %v1275_v17, %v4649_v6  ;;  %v1314_v20 = vsel %vm1304_vm4, %v1281_v62, %v4650_v40 }
 0x25a   : > { %v3820_v47 = vpop.permute.xlu2 %970 }
 0x25b   : > { %v957_v60 = vpop.permute.xlu1 %956  ;;  %v1159_v3 = vpop.permute.xlu0 %1158 }
 0x25c   : > { %v1478_v50 = vsel %vm1469_vm10, %v1445_v12, %v1159_v3  ;;  %v1341_v12 = vsel %vm1337_vm5, %v1308_v54, %v4651_v58  ;;  %v4652_v3 = vld [vmem:[#allocation139_spill] sm:$0xff]  ;;  %v4658_v58 = vld [vmem:[#allocation20_spill] sm:$0xff] }
 0x25d   : > { %2008 = vmatmul.msk.f32.vlgmr.msra.gmra.mxu1 %vm1507_vm11, %v1478_v50  ;;  %v1347_v50 = vsel %vm1337_vm5, %v1314_v20, %v4652_v3 }
 0x260   : > { %990 = vrot.lane.b32.xlu2 %v2131_v51, %s2244_s8  ;;  %v1374_v51 = vsel %vm1370_vm6, %v1341_v12, %v3342_v0  ;;  %v2134_v12 = vld [vmem:[%s2320_s28 + $0xd8] sm:$0xff] }
 0x261   : > { %1072 = vrot.lane.b32.xlu1 %v4643_v5, %s2243_s7  ;;  %1060 = vrot.lane.b32.xlu0 %v4644_v27, %s2243_s7  ;;  %v1380_v5 = vsel %vm1370_vm6, %v1347_v50, %v3366_v52  ;;  %v4654_v27 = vld [vmem:[#allocation43_spill] sm:$0xff]  ;;  %v1407_v39 = vsel %vm1403_vm8, %v1374_v51, %v957_v60  ;;  %v4656_v60 = vld [vmem:[#allocation33_spill] sm:$0xff]  ;;  %v4660_v51 = vld [vmem:[#allocation62_spill] sm:$0xff] }
 0x262   : > { %v3831_v61 = vpop.permute.xlu2 %984  ;;  %v1413_v56 = vsel %vm1403_vm8, %v1380_v5, %v3748_v53  ;;  %v4655_v53 = vld [vmem:[#allocation64_spill] sm:$0xff]  ;;  %v4659_v50 = vld [vmem:[#allocation35_spill] sm:$0xff]  ;;  %v1249_v5 = vsel %vm1238_vm2, %v3717_v35, %v4660_v51  ;;  %v4667_v35 = vld [vmem:[#allocation53_spill] sm:$0xff] }
 0x263   : > { %v1065_v1 = vpop.permute.xlu1 %1064  ;;  %v1053_v31 = vpop.permute.xlu0 %1052 }
 0x264   : > { %v1446_v36 = vsel %vm1436_vm9, %v1413_v56, %v1065_v1  ;;  %v1440_v37 = vsel %vm1436_vm9, %v1407_v39, %v1053_v31  ;;  %v4657_v1 = vld [vmem:[#allocation27_spill] sm:$0xff]  ;;  %v1420_v31 = vsel %vm1403_vm8, %v3538_v44, %v3771_v8  ;;  %v4662_v56 = vld [vmem:[#allocation97_spill] sm:$0xff] }
 0x265   : > { %v1453_v6 = vsel %vm1436_vm9, %v1420_v31, %v1079_v13  ;;  %v2135_v13 = vld [vmem:[%s2320_s28 + $0x30] sm:$0xff]  ;;  %v1282_v39 = vsel %vm1271_vm3, %v1249_v5, %v4662_v56 }
 0x266   : > { %v4671_v5 = vld [vmem:[#allocation45_spill] sm:$0xff] }
 0x268   : > { %1168 = vrot.lane.b32.xlu2 %v4653_v63, %s2245_s9  ;;  %v1243_v63 = vsel %vm1238_vm2, %v2135_v13, %v4659_v50 }
 0x269   : > { %1156 = vrot.lane.b32.xlu1 %v4654_v27, %s2245_s9  ;;  %1002 = vrot.lane.b32.xlu0 %v2133_v28, %s2244_s8  ;;  %v4661_v27 = vld [vmem:[#allocation93_spill] sm:$0xff] }
 0x26a   : > { %v1081_v43 = vpop.permute.xlu2 %1080  ;;  %v1276_v28 = vsel %vm1271_vm3, %v1243_v63, %v4661_v27  ;;  %v1250_v27 = vsel %vm1238_vm2, %v3812_v23, %v4671_v5  ;;  %v2137_v5 = vld [vmem:[%s2320_s28 + $0x188] sm:$0xff] }
 0x26b   : > { %v1161_v0 = vpop.permute.xlu1 %1160  ;;  %v1149_v17 = vpop.permute.xlu0 %1148 }
 0x26c   : > { %v1473_v52 = vsel %vm1469_vm10, %v1440_v37, %v1149_v17  ;;  %v1479_v16 = vsel %vm1469_vm10, %v1446_v36, %v1161_v0  ;;  %v4663_v36 = vld [vmem:[#allocation107_spill] sm:$0xff]  ;;  %v4664_v37 = vld [vmem:[#allocation13_spill] sm:$0xff] }
 0x26d   : > { %2003 = vmatmul.msk.f32.gmra.mxu0 %vm1507_vm11, %v1473_v52  ;;  %2009 = vmatmul.msk.f32.gmra.mxu1 %vm1507_vm11, %v1479_v16  ;;  %v1315_v0 = vsel %vm1304_vm4, %v1282_v39, %v4664_v37  ;;  %v4665_v17 = vld [vmem:[#allocation135_spill] sm:$0xff]  ;;  %v4673_v39 = vld [vmem:[#allocation121_spill] sm:$0xff] }
 0x26e   : > { %v4666_v16 = vld [vmem:[#allocation59_spill] sm:$0xff] }
 0x270   : > { %1182 = vrot.lane.b32.xlu2 %v4655_v53, %s2245_s9  ;;  %v1348_v53 = vsel %vm1337_vm5, %v1315_v0, %v4666_v16 }
 0x271   : > { %1098 = vrot.lane.b32.xlu1 %v4656_v60, %s2243_s7  ;;  %1086 = vrot.lane.b32.xlu0 %v4657_v1, %s2243_s7  ;;  %v1381_v1 = vsel %vm1370_vm6, %v1348_v53, %v3448_v48  ;;  %v4677_v53 = vld [vmem:[#allocation37_spill] sm:$0xff] }
 0x272   : > { %v973_v62 = vpop.permute.xlu2 %972  ;;  %v1414_v31 = vsel %vm1403_vm8, %v1381_v1, %v3820_v47  ;;  %v4670_v47 = vld [vmem:[#allocation26_spill] sm:$0xff] }
 0x273   : > { %v959_v54 = vpop.permute.xlu1 %958  ;;  %v1175_v40 = vpop.permute.xlu0 %1174 }
 0x274   : > { %v1486_v20 = vsel %vm1469_vm10, %v1453_v6, %v1175_v40 }
 0x275   : > { %2016 = vmatmul.msk.f32.vlgmr.msra.gmra.mxu2 %vm1507_vm11, %v1486_v20 }
 0x278   : > { %1074 = vrot.lane.b32.xlu2 %v4658_v58, %s2243_s7 }
 0x279   : > { %978 = vrot.lane.b32.xlu1 %v2134_v12, %s2244_s8  ;;  %1194 = vrot.lane.b32.xlu0 %v2892_v38, %s2245_s9  ;;  %v1309_v38 = vsel %vm1304_vm4, %v1276_v28, %v4663_v36  ;;  %v4672_v28 = vld [vmem:[#allocation96_spill] sm:$0xff] }
 0x27a   : > { %v3888_v3 = vpop.permute.xlu2 %986  ;;  %v1342_v52 = vsel %vm1337_vm5, %v1309_v38, %v4665_v17  ;;  %v1283_v56 = vsel %vm1271_vm3, %v1250_v27, %v4672_v28  ;;  %v4676_v38 = vld [vmem:[#allocation78_spill] sm:$0xff]  ;;  %v2138_v27 = vld [vmem:[%s2320_s28 + $0x140] sm:$0xff]  ;;  %v4685_v28 = vld [vmem:[#allocation141_spill] sm:$0xff] }
 0x27b   : > { %v1067_v44 = vpop.permute.xlu1 %1066  ;;  %v1055_v8 = vpop.permute.xlu0 %1054  ;;  %v1375_v60 = vsel %vm1370_vm6, %v1342_v52, %v3403_v19  ;;  %v1316_v36 = vsel %vm1304_vm4, %v1283_v56, %v4673_v39 }
 0x27c   : > { %v1408_v6 = vsel %vm1403_vm8, %v1375_v60, %v959_v54  ;;  %v1447_v20 = vsel %vm1436_vm9, %v1414_v31, %v1067_v44  ;;  %v1421_v54 = vsel %vm1403_vm8, %v3535_v4, %v3831_v61  ;;  %v4674_v4 = vld [vmem:[#allocation19_spill] sm:$0xff]  ;;  %v4675_v61 = vld [vmem:[#allocation42_spill] sm:$0xff]  ;;  %v4678_v60 = vld [vmem:[#allocation92_spill] sm:$0xff] }
 0x27d   : > { %v1441_v58 = vsel %vm1436_vm9, %v1408_v6, %v1055_v8  ;;  %v1454_v8 = vsel %vm1436_vm9, %v1421_v54, %v1081_v43  ;;  %v1349_v43 = vsel %vm1337_vm5, %v1316_v36, %v4675_v61  ;;  %v4679_v31 = vld [vmem:[#allocation116_spill] sm:$0xff]  ;;  %v1422_v54 = vsel %vm1403_vm8, %v3422_v30, %v3888_v3  ;;  %v4686_v61 = vld [vmem:[#allocation69_spill] sm:$0xff] }
 0x27e   : > { %v1382_v23 = vsel %vm1370_vm6, %v1349_v43, %v3443_v22  ;;  %v4680_v6 = vld [vmem:[#allocation40_spill] sm:$0xff] }
 0x27f   : > { %v1415_v0 = vsel %vm1403_vm8, %v1382_v23, %v973_v62 }
 0x280   : > { %1170 = vrot.lane.b32.xlu2 %v4667_v35, %s2245_s9  ;;  %v1244_v35 = vsel %vm1238_vm2, %v3336_v10, %v4677_v53  ;;  %v2136_v10 = vld [vmem:[%s2320_s28 + $0x180] sm:$0xff] }
 0x281   : > { %1004 = vrot.lane.b32.xlu1 %v3707_v33, %s2244_s8  ;;  %992 = vrot.lane.b32.xlu0 %v3644_v49, %s2244_s8  ;;  %v4668_v49 = vld [vmem:[#allocation72_spill] sm:$0xff]  ;;  %v1277_v1 = vsel %vm1271_vm3, %v1244_v35, %v4678_v60  ;;  %v4692_v60 = vld [vmem:[#allocation30_spill] sm:$0xff] }
 0x282   : > { %v1165_v40 = vpop.permute.xlu2 %1164  ;;  %v4669_v33 = vld [vmem:[#allocation32_spill] sm:$0xff]  ;;  %v1310_v22 = vsel %vm1304_vm4, %v1277_v1, %v4679_v31 }
 0x283   : > { %v1163_v19 = vpop.permute.xlu1 %1162  ;;  %v1151_v12 = vpop.permute.xlu0 %1150  ;;  %v1343_v62 = vsel %vm1337_vm5, %v1310_v22, %v4680_v6  ;;  %v4690_v53 = vld [vmem:[#allocation140_spill] sm:$0xff] }
 0x284   : > { %v1474_v48 = vsel %vm1469_vm10, %v1441_v58, %v1151_v12  ;;  %v1480_v13 = vsel %vm1469_vm10, %v1447_v20, %v1163_v19  ;;  %v4681_v20 = vld [vmem:[#allocation60_spill] sm:$0xff]  ;;  %v1376_v58 = vsel %vm1370_vm6, %v1343_v62, %v3398_v15  ;;  %v4682_v15 = vld [vmem:[#allocation71_spill] sm:$0xff] }
 0x285   : > { %2004 = vmatmul.msk.f32.gmra.mxu0 %vm1507_vm11, %v1474_v48  ;;  %2010 = vmatmul.msk.f32.gmra.mxu1 %vm1507_vm11, %v1480_v13 }
 0x288   : > { %1184 = vrot.lane.b32.xlu2 %v4668_v49, %s2245_s9 }
 0x289   : > { %1100 = vrot.lane.b32.xlu1 %v4669_v33, %s2243_s7  ;;  %1088 = vrot.lane.b32.xlu0 %v4670_v47, %s2243_s7  ;;  %v4683_v33 = vld [vmem:[#allocation126_spill] sm:$0xff] }
 0x28a   : > { %v1179_v44 = vpop.permute.xlu2 %1178 }
 0x28b   : > { %v961_v50 = vpop.permute.xlu1 %960  ;;  %v1177_v63 = vpop.permute.xlu0 %1176 }
 0x28c   : > { %v1487_v51 = vsel %vm1469_vm10, %v1454_v8, %v1177_v63 }
 0x28d   : > { %2017 = vmatmul.msk.f32.gmra.mxu2 %vm1507_vm11, %v1487_v51 }
 0x290   : > { %1076 = vrot.lane.b32.xlu2 %v4674_v4, %s2243_s7  ;;  %v2139_v4 = vld [vmem:[%s2320_s28 + $0x90] sm:$0xff] }
 0x291   : > { %980 = vrot.lane.b32.xlu1 %v3547_v26, %s2244_s8  ;;  %1196 = vrot.lane.b32.xlu0 %v4676_v38, %s2245_s9  ;;  %v1251_v43 = vsel %vm1238_vm2, %v2139_v4, %v4686_v61  ;;  %v4687_v38 = vld [vmem:[#allocation89_spill] sm:$0xff] }
 0x292   : > { %v975_v37 = vpop.permute.xlu2 %974  ;;  %v1284_v23 = vsel %vm1271_vm3, %v1251_v43, %v4687_v38 }
 0x293   : > { %v1069_v17 = vpop.permute.xlu1 %1068  ;;  %v1057_v52 = vpop.permute.xlu0 %1056 }
 0x294   : > { %v1448_v16 = vsel %vm1436_vm9, %v1415_v0, %v1069_v17  ;;  %v4688_v0 = vld [vmem:[#allocation120_spill] sm:$0xff]  ;;  %v231_v17 = vld [vmem:[%s2320_s28 + $0x198] sm:$0xff] }
 0x295   : > { %v1481_v26 = vsel %vm1469_vm10, %v1448_v16, %v1165_v40  ;;  %v1409_v40 = vsel %vm1403_vm8, %v1376_v58, %v961_v50  ;;  %v4689_v16 = vld [vmem:[#allocation70_spill] sm:$0xff]  ;;  %v460_v1 = vrot.slane %v231_v17, 1 }
 0x296   : > { %2011 = vmatmul.msk.f32.gmra.mxu1 %vm1507_vm11, %v1481_v26  ;;  %v1442_v12 = vsel %vm1436_vm9, %v1409_v40, %v1057_v52  ;;  %v232_v52 = vld [vmem:[%s2320_s28 + $0x1a0] sm:$0xff]  ;;  %v4691_v26 = vld [vmem:[#allocation125_spill] sm:$0xff] }
 0x297   : > { %v461_v31 = vrot.slane %v232_v52, 1  ;;  %v2140_v40 = vld [vmem:[%s2320_s28 + $0x48] sm:$0xff] }
 0x298   : > { %1172 = vrot.lane.b32.xlu2 %v4681_v20, %s2245_s9 }
 0x299   : > { %1006 = vrot.lane.b32.xlu1 %v2136_v10, %s2244_s8  ;;  %994 = vrot.lane.b32.xlu0 %v3638_v41, %s2244_s8  ;;  %v4684_v41 = vld [vmem:[#allocation25_spill] sm:$0xff] }
 0x29a   : > { %v3978_v19 = vpop.permute.xlu2 %988 }
 0x29b   : > { %v1153_v48 = vpop.permute.xlu1 %1152  ;;  %v999_v13 = vpop.permute.xlu0 %998 }
 0x29c   : > { %v1475_v49 = vsel %vm1469_vm10, %v1442_v12, %v1153_v48  ;;  %v1428_v30 = vsel %vm1403_vm8, %v3484_v21, %v999_v13  ;;  %v1317_v21 = vsel %vm1304_vm4, %v1284_v23, %v4688_v0  ;;  %v4693_v12 = vld [vmem:[#allocation58_spill] sm:$0xff]  ;;  %v1423_v23 = vsel %vm1403_vm8, %v3589_v46, %v3978_v19 }
 0x29d   : > { %2005 = vmatmul.msk.f32.gmra.mxu0 %vm1507_vm11, %v1475_v49  ;;  %v1350_v35 = vsel %vm1337_vm5, %v1317_v21, %v4690_v53  ;;  %v1245_v48 = vsel %vm1238_vm2, %v2140_v40, %v4693_v12  ;;  %v462_v49 = vsel %vm282_vm0, %v460_v1, %v461_v31 }
 0x29e   : > { %v1383_v22 = vsel %vm1370_vm6, %v1350_v35, %v3378_v42  ;;  %v4695_v42 = vld [vmem:[#allocation115_spill] sm:$0xff] }
 0x29f   : > { %v1416_v6 = vsel %vm1403_vm8, %v1383_v22, %v975_v37 }
 0x2a0   : > { %1186 = vrot.lane.b32.xlu2 %v4682_v15, %s2245_s9  ;;  %v4694_v15 = vld [vmem:[#allocation83_spill] sm:$0xff] }
 0x2a1   : > { %1102 = vrot.lane.b32.xlu1 %v4683_v33, %s2243_s7  ;;  %1090 = vrot.lane.b32.xlu0 %v4684_v41, %s2243_s7  ;;  %v1278_v33 = vsel %vm1271_vm3, %v1245_v48, %v4694_v15  ;;  %v4696_v41 = vld [vmem:[#allocation138_spill] sm:$0xff]  ;;  %v4699_v15 = vld [vmem:[#allocation57_spill] sm:$0xff] }
 0x2a2   : > { %v1167_v47 = vpop.permute.xlu2 %1166  ;;  %v1311_v37 = vsel %vm1304_vm4, %v1278_v33, %v4695_v42 }
 0x2a3   : > { %v1095_v8 = vpop.permute.xlu1 %1094  ;;  %v1083_v50 = vpop.permute.xlu0 %1082 }
 0x2a4   : > { %v1455_v63 = vsel %vm1436_vm9, %v1422_v54, %v1083_v50  ;;  %v1344_v54 = vsel %vm1337_vm5, %v1311_v37, %v4696_v41  ;;  %v4697_v50 = vld [vmem:[#allocation143_spill] sm:$0xff] }
 0x2a5   : > { %v1488_v51 = vsel %vm1469_vm10, %v1455_v63, %v1179_v44  ;;  %v1461_v44 = vsel %vm1436_vm9, %v1428_v30, %v1095_v8  ;;  %v233_v8 = vld [vmem:[%s2320_s28 + $0x1a8] sm:$0x3]  ;;  %v1377_v63 = vsel %vm1370_vm6, %v1344_v54, %v4697_v50  ;;  %v4700_v37 = vld [vmem:[#allocation95_spill] sm:$0xff] }
 0x2a6   : > { %2018 = vmatmul.msk.f32.gmra.mxu2 %vm1507_vm11, %v1488_v51  ;;  %v463_v51 = vrot.slane %v233_v8, 1  ;;  %v468_v38 = vrot.slane %v233_v8, 2  ;;  %v4702_v8 = vld [vmem:[#allocation137_spill] sm:$0xff] }
 0x2a8   : > { %1008 = vrot.lane.b32.xlu2 %v2137_v5, %s2244_s8  ;;  %v464_v4 = vsel %vm282_vm0, %v461_v31, %v463_v51 }
 0x2a9   : > { %996 = vrot.lane.b32.xlu1 %v2138_v27, %s2244_s8  ;;  %1198 = vrot.lane.b32.xlu0 %v4685_v28, %s2245_s9  ;;  %v465_v27 = vrot.slane %v231_v17, 2  ;;  %v466_v28 = vrot.slane %v232_v52, 2 }
 0x2aa   : > { %v4003_v3 = vpop.permute.xlu2 %1180 }
 0x2ab   : > { %v963_v56 = vpop.permute.xlu1 %962  ;;  %v1191_v39 = vpop.permute.xlu0 %1190  ;;  %v467_v43 = vsel %vm363_vm1, %v465_v27, %v466_v28 }
 0x2ac   : > { %v1494_v36 = vsel %vm1469_vm10, %v1461_v44, %v1191_v39  ;;  %v1410_v5 = vsel %vm1403_vm8, %v1377_v63, %v963_v56 }
 0x2ad   : > { %2024 = vmatmul.msk.f32.vlgmr.msra.gmra.mxu3 %vm1507_vm11, %v1494_v36 }
 0x2b0   : > { %1188 = vrot.lane.b32.xlu2 %v4689_v16, %s2245_s9  ;;  %v469_v16 = vsel %vm363_vm1, %v466_v28, %v468_v38 }
 0x2b1   : > { %1104 = vrot.lane.b32.xlu1 %v4691_v26, %s2243_s7  ;;  %1092 = vrot.lane.b32.xlu0 %v4692_v60, %s2243_s7 }
 0x2b2   : > { %v977_v10 = vpop.permute.xlu2 %976 }
 0x2b3   : > { %v1071_v62 = vpop.permute.xlu1 %1070  ;;  %v1059_v20 = vpop.permute.xlu0 %1058 }
 0x2b4   : > { %v1449_v58 = vsel %vm1436_vm9, %v1416_v6, %v1071_v62  ;;  %v1443_v30 = vsel %vm1436_vm9, %v1410_v5, %v1059_v20 }
 0x2b5   : > { %v1482_v13 = vsel %vm1469_vm10, %v1449_v58, %v1167_v47  ;;  %v4698_v47 = vld [vmem:[#allocation142_spill] sm:$0xff] }
 0x2b6   : > { %2012 = vmatmul.msk.f32.gmra.mxu1 %vm1507_vm11, %v1482_v13 }
 0x2b8   : > { %1106 = vrot.lane.b32.xlu2 %v462_v49, %s2243_s7  ;;  %v2141_v49 = vld [vmem:[%s2320_s28 + $0x50] sm:$0xff]  ;;  %s2039_s28 = sshll.u32 %s2288_s16, 8 }
 0x2b9   : > { %1010 = vrot.lane.b32.xlu1 %v231_v17, %s2244_s8  ;;  %1200 = vrot.lane.b32.xlu0 %v4698_v47, %s2245_s9  ;;  %v1246_v33 = vsel %vm1238_vm2, %v2141_v49, %v4699_v15 }
 0x2ba   : > { %v991_v61 = vpop.permute.xlu2 %990  ;;  %v1279_v41 = vsel %vm1271_vm3, %v1246_v33, %v4700_v37 }
 0x2bb   : > { %v1155_v44 = vpop.permute.xlu1 %1154  ;;  %v1001_v39 = vpop.permute.xlu0 %1000 }
 0x2bc   : > { %v1476_v36 = vsel %vm1469_vm10, %v1443_v30, %v1155_v44  ;;  %v1429_v46 = vsel %vm1403_vm8, %v3673_v11, %v1001_v39  ;;  %v1417_v11 = vsel %vm1403_vm8, %v3490_v2, %v977_v10  ;;  %v4701_v2 = vld [vmem:[#allocation8_spill] sm:$0xff] }
 0x2bd   : > { %2006 = vmatmul.msk.f32.gmra.mxu0 %vm1507_vm11, %v1476_v36  ;;  %v1312_v10 = vsel %vm1304_vm4, %v1279_v41, %v4701_v2 }
 0x2be   : > { %v1345_v50 = vsel %vm1337_vm5, %v1312_v10, %v4702_v8 }
 0x2bf   : > { %v1378_v63 = vsel %vm1370_vm6, %v1345_v50, %v3424_v57  ;;  %v1424_v57 = vsel %vm1403_vm8, %v3586_v9, %v991_v61 }
 0x2c0   : > { %1108 = vrot.lane.b32.xlu2 %v464_v4, %s2243_s7 }
 0x2c1   : > { %1012 = vrot.lane.b32.xlu1 %v232_v52, %s2244_s8  ;;  %1202 = vrot.lane.b32.xlu0 %v467_v43, %s2245_s9 }
 0x2c2   : > { %v1625_v56 = vpop.f32.mrf.mxu0  ;;  %v1169_v53 = vpop.permute.xlu2 %1168 }
 0x2c3   : > { %1721 = vst [vmem:[%s4064_s6] sm:$0xff] %v1625_v56  ;;  %v1097_v0 = vpop.permute.xlu1 %1096  ;;  %v1085_v21 = vpop.permute.xlu0 %1084  ;;  %v1790_v35 = vmul.f32 %v1625_v56, %v1625_v56 }
 0x2c4   : > { %v1456_v17 = vsel %vm1436_vm9, %v1423_v23, %v1085_v21  ;;  %v1462_v26 = vsel %vm1436_vm9, %v1429_v46, %v1097_v0 }
 0x2c5   : > { %v1489_v52 = vsel %vm1469_vm10, %v1456_v17, %v4003_v3 }
 0x2c6   : > { %2019 = vmatmul.msk.f32.gmra.mxu2 %vm1507_vm11, %v1489_v52 }
 0x2c9   : > { %1204 = vrot.lane.b32.xlu0 %v469_v16, %s2245_s9  ;;  %s1879_s9 = scalar_lea.hbm %s4295_s2, %s2039_s28 }
 0x2ca   : > { %v1628_v19 = vpop.f32.mrf.mxu0  ;;  %v1183_v62 = vpop.permute.xlu2 %1182  ;;  %s1882_s11 = sshll.u32 %s1879_s9, 4  ;;  %s1883_s11 = int_to_ptr.hbm [resolvable:$true] %s1882_s11 }
 0x2cb   : > { %1722 = vst [vmem:[%s4064_s6 + $0x8] sm:$0xff] %v1628_v19  ;;  %v1753_v60 = vadd.f32 %v1628_v19, %v1625_v56  ;;  %v1791_v1 = vmul.f32 %v1628_v19, %v1628_v19  ;;  %v965_v3 = vpop.permute.xlu1 %964  ;;  %v1193_v31 = vpop.permute.xlu0 %1192  ;;  %s2156_s19 = sshra.s32 %s1883_s11, 4  ;;  %s2157_s19 = int_to_ptr.hbm [resolvable:$true] %s2156_s19 }
 0x2cc   : > { %v1495_v22 = vsel %vm1469_vm10, %v1462_v26, %v1193_v31  ;;  %v1411_v47 = vsel %vm1403_vm8, %v1378_v63, %v965_v3  ;;  %s2158_s20 = scalar_lea.hbm %s2157_s19, 256  ;;  %p2163_p0 = scmp.lt.s32.totalorder %s2157_s19, %s4295_s2 }
 0x2cd   : > { %v1822_v6 = vadd.f32 %v1791_v1, %v1790_v35  ;;  %2025 = vmatmul.msk.f32.gmra.mxu3 %vm1507_vm11, %v1495_v22  ;;  %p2159_p11 = scmp.ne.s32.totalorder %s2157_s19, %s2158_s20  ;;  %p2164_p1 = scmp.lt.s32.totalorder %s2162_s26, %s2158_s20 }
 0x2cf   : > { %p2160_p12 = pnand %p2159_p11, %p2305_p5  ;;  %p2165_p2 = por %p2164_p1, %p2163_p0 }
 0x2d1   : > { %p2161_p13 = pneg %p2160_p12 }
 0x2d2   : > { %v1075_v44 = vpop.permute.xlu2 %1074 }
 0x2d3   : > { %v1073_v20 = vpop.permute.xlu1 %1072  ;;  %v1631_v58 = vpop.f32.mrf.mxu0  ;;  %p2166_p3 = pnand %p2165_p2, %p2161_p13 }
 0x2d4   : > { %v1450_v40 = vsel %vm1436_vm9, %v1417_v11, %v1073_v20  ;;  %1723 = vst [vmem:[%s4064_s6 + $0x10] sm:$0xff] %v1631_v58  ;;  %v1754_v12 = vadd.f32 %v1753_v60, %v1631_v58  ;;  %v1792_v48 = vmul.f32 %v1631_v58, %v1631_v58  ;;  %v1061_v13 = vpop.permute.xlu0 %1060 }
 0x2d5   : > { %v1483_v42 = vsel %vm1469_vm10, %v1450_v40, %v1169_v53  ;;  %v1444_v5 = vsel %vm1436_vm9, %v1411_v47, %v1061_v13 }
 0x2d6   : > { %v1823_v54 = vadd.f32 %v1822_v6, %v1792_v48  ;;  %2013 = vmatmul.msk.f32.gmra.mxu1 %vm1507_vm11, %v1483_v42 }
 0x2da   : > { %v4097_v51 = vpop.f32.mrf.mxu1  ;;  %v1171_v56 = vpop.permute.xlu2 %1170 }
 0x2db   : > { %1729 = vst [vmem:[%s4064_s6 + $0x40] sm:$0xff] %v4097_v51  ;;  %v1157_v27 = vpop.permute.xlu1 %1156 }
 0x2dc   : > { %v1003_v28 = vpop.permute.xlu0 %1002  ;;  %v1477_v30 = vsel %vm1469_vm10, %v1444_v5, %v1157_v27 }
 0x2dd   : > { %2007 = vmatmul.msk.f32.gmra.mxu0 %vm1507_vm11, %v1477_v30  ;;  %v1430_v0 = vsel %vm1403_vm8, %v3670_v32, %v1003_v28 }
 0x2e2   : > { %v1185_v35 = vpop.permute.xlu2 %1184 }
 0x2e3   : > { %v1099_v39 = vpop.permute.xlu1 %1098 }
 0x2e4   : > { %v1087_v36 = vpop.permute.xlu0 %1086  ;;  %v1463_v9 = vsel %vm1436_vm9, %v1430_v0, %v1099_v39 }
 0x2e5   : > { %v1457_v4 = vsel %vm1436_vm9, %v1424_v57, %v1087_v36 }
 0x2e6   : > { %v1490_v43 = vsel %vm1469_vm10, %v1457_v4, %v1183_v62 }
 0x2e7   : > { %2020 = vmatmul.msk.f32.gmra.mxu2 %vm1507_vm11, %v1490_v43 }
 0x2ea   : > { %v1634_v38 = vpop.f32.mrf.mxu0  ;;  %v4109_v23 = vpop.f32.mrf.mxu1 }
 0x2eb   : > { %1724 = vst [vmem:[%s4064_s6 + $0x18] sm:$0xff] %v1634_v38  ;;  %v1755_v21 = vadd.f32 %v1754_v12, %v1634_v38  ;;  %v1793_v17 = vmul.f32 %v1634_v38, %v1634_v38  ;;  %v979_v52 = vpop.permute.xlu1 %978 }
 0x2ec   : > { %1730 = vst [vmem:[%s4064_s6 + $0x48] sm:$0xff] %v4109_v23  ;;  %v1418_v61 = vsel %vm1403_vm8, %v3487_v29, %v979_v52  ;;  %v1195_v16 = vpop.permute.xlu0 %1194  ;;  %v1077_v29 = vpop.permute.xlu2 %1076 }
 0x2ed   : > { %v1824_v53 = vadd.f32 %v1823_v54, %v1793_v17  ;;  %v1496_v46 = vsel %vm1469_vm10, %v1463_v9, %v1195_v16  ;;  %v1451_v19 = vsel %vm1436_vm9, %v1418_v61, %v1075_v44 }
 0x2ee   : > { %2026 = vmatmul.msk.f32.gmra.mxu3 %vm1507_vm11, %v1496_v46  ;;  %v1484_v32 = vsel %vm1469_vm10, %v1451_v19, %v1171_v56 }
 0x2ef   : > { %2014 = vmatmul.msk.f32.gmra.mxu1 %vm1507_vm11, %v1484_v32 }
 0x2f3   : > { %v1005_v26 = vpop.permute.xlu1 %1004 }
 0x2f4   : > { %v993_v60 = vpop.permute.xlu0 %992  ;;  %v1431_v58 = vsel %vm1403_vm8, %v3532_v45, %v1005_v26  ;;  %v1173_v15 = vpop.permute.xlu2 %1172 }
 0x2f5   : > { %v1425_v31 = vsel %vm1403_vm8, %v3446_v24, %v993_v60 }
 0x2f8   : > { %v4124_v1 = vpop.f32.mrf.mxu2 }
 0x2f9   : > { %1737 = vst [vmem:[%s4064_s6 + $0x80] sm:$0xff] %v4124_v1 }
 0x2fb   : > { %v1101_v3 = vpop.permute.xlu1 %1100 }
 0x2fc   : > { %v1089_v22 = vpop.permute.xlu0 %1088  ;;  %v1464_v24 = vsel %vm1436_vm9, %v1431_v58, %v1101_v3 }
 0x2fd   : > { %v1458_v6 = vsel %vm1436_vm9, %v1425_v31, %v1089_v22 }
 0x2fe   : > { %v1491_v62 = vsel %vm1469_vm10, %v1458_v6, %v1185_v35 }
 0x2ff   : > { %2021 = vmatmul.msk.f32.gmra.mxu2 %vm1507_vm11, %v1491_v62 }
 0x302   : > { %v1637_v11 = vpop.f32.mrf.mxu0  ;;  %v4133_v20 = vpop.f32.mrf.mxu1 }
 0x303   : > { %1725 = vst [vmem:[%s4064_s6 + $0x20] sm:$0xff] %v1637_v11  ;;  %v1756_v40 = vadd.f32 %v1755_v21, %v1637_v11  ;;  %v1794_v12 = vmul.f32 %v1637_v11, %v1637_v11  ;;  %v981_v48 = vpop.permute.xlu1 %980 }
 0x304   : > { %1731 = vst [vmem:[%s4064_s6 + $0x50] sm:$0xff] %v4133_v20  ;;  %v1419_v13 = vsel %vm1403_vm8, %v3401_v25, %v981_v48  ;;  %v1197_v49 = vpop.permute.xlu0 %1196  ;;  %v1187_v25 = vpop.permute.xlu2 %1186 }
 0x305   : > { %v1825_v33 = vadd.f32 %v1824_v53, %v1794_v12  ;;  %v1497_v42 = vsel %vm1469_vm10, %v1464_v24, %v1197_v49  ;;  %v1452_v45 = vsel %vm1436_vm9, %v1419_v13, %v1077_v29 }
 0x306   : > { %2027 = vmatmul.msk.f32.gmra.mxu3 %vm1507_vm11, %v1497_v42  ;;  %v1485_v37 = vsel %vm1469_vm10, %v1452_v45, %v1173_v15  ;;  %v1798_v15 = vmul.f32 %v4097_v51, %v4097_v51  ;;  %v1799_v45 = vmul.f32 %v4109_v23, %v4109_v23 }
 0x307   : > { %2015 = vmatmul.msk.f32.gmra.mxu1 %vm1507_vm11, %v1485_v37 }
 0x30b   : > { %v1007_v41 = vpop.permute.xlu1 %1006 }
 0x30c   : > { %v995_v54 = vpop.permute.xlu0 %994  ;;  %v1009_v28 = vpop.permute.xlu2 %1008  ;;  %v1432_v30 = vsel %vm1403_vm8, %v3704_v55, %v1007_v41 }
 0x30d   : > { %v1426_v50 = vsel %vm1403_vm8, %v3635_v34, %v995_v54  ;;  %v1433_v9 = vsel %vm1403_vm8, %v3701_v7, %v1009_v28  ;;  %v1800_v54 = vmul.f32 %v4133_v20, %v4133_v20 }
 0x310   : > { %v4148_v2 = vpop.f32.mrf.mxu2 }
 0x311   : > { %1738 = vst [vmem:[%s4064_s6 + $0x88] sm:$0xff] %v4148_v2 }
 0x313   : > { %v1103_v10 = vpop.permute.xlu1 %1102  ;;  %v4152_v8 = vpop.f32.mrf.mxu1 }
 0x314   : > { %1732 = vst [vmem:[%s4064_s6 + $0x58] sm:$0xff] %v4152_v8  ;;  %v1091_v63 = vpop.permute.xlu0 %1090  ;;  %v1465_v34 = vsel %vm1436_vm9, %v1432_v30, %v1103_v10  ;;  %v1189_v38 = vpop.permute.xlu2 %1188 }
 0x315   : > { %v1459_v47 = vsel %vm1436_vm9, %v1426_v50, %v1091_v63  ;;  %v1801_v50 = vmul.f32 %v4152_v8, %v4152_v8 }
 0x316   : > { %v1492_v5 = vsel %vm1469_vm10, %v1459_v47, %v1187_v25 }
 0x317   : > { %2022 = vmatmul.msk.f32.gmra.mxu2 %vm1507_vm11, %v1492_v5 }
 0x31a   : > { %v1640_v27 = vpop.f32.mrf.mxu0 }
 0x31b   : > { %1726 = vst [vmem:[%s4064_s6 + $0x28] sm:$0xff] %v1640_v27  ;;  %v1757_v44 = vadd.f32 %v1756_v40, %v1640_v27  ;;  %v1795_v39 = vmul.f32 %v1640_v27, %v1640_v27  ;;  %v997_v57 = vpop.permute.xlu1 %996 }
 0x31c   : > { %v1199_v36 = vpop.permute.xlu0 %1198  ;;  %v1427_v0 = vsel %vm1403_vm8, %v3632_v14, %v997_v57  ;;  %v1107_v46 = vpop.permute.xlu2 %1106 }
 0x31d   : > { %v1826_v4 = vadd.f32 %v1825_v33, %v1795_v39  ;;  %v1498_v43 = vsel %vm1469_vm10, %v1465_v34, %v1199_v36 }
 0x31e   : > { %2028 = vmatmul.msk.f32.gmra.mxu3 %vm1507_vm11, %v1498_v43 }
 0x323   : > { %v1105_v56 = vpop.permute.xlu1 %1104 }
 0x324   : > { %v1093_v55 = vpop.permute.xlu0 %1092  ;;  %v1466_v61 = vsel %vm1436_vm9, %v1433_v9, %v1105_v56  ;;  %v1109_v31 = vpop.permute.xlu2 %1108 }
 0x325   : > { %v1460_v21 = vsel %vm1436_vm9, %v1427_v0, %v1093_v55  ;;  %v1806_v0 = vmul.f32 %v4124_v1, %v4124_v1 }
 0x326   : > { %v1493_v17 = vsel %vm1469_vm10, %v1460_v21, %v1189_v38 }
 0x327   : > { %2023 = vmatmul.msk.f32.gmra.mxu2 %vm1507_vm11, %v1493_v17  ;;  %v1807_v17 = vmul.f32 %v4148_v2, %v4148_v2 }
 0x329   : > { %v4172_v52 = vpop.f32.mrf.mxu2 }
 0x32a   : > { %1739 = vst [vmem:[%s4064_s6 + $0x90] sm:$0xff] %v4172_v52 }
 0x32b   : > { %v1011_v16 = vpop.permute.xlu1 %1010 }
 0x32c   : > { %v1201_v14 = vpop.permute.xlu0 %1200  ;;  %v1434_v32 = vsel %vm1403_vm8, %v3580_v18, %v1011_v16 }
 0x32d   : > { %v1499_v53 = vsel %vm1469_vm10, %v1466_v61, %v1201_v14  ;;  %v1467_v7 = vsel %vm1436_vm9, %v1434_v32, %v1107_v46  ;;  %v1808_v14 = vmul.f32 %v4172_v52, %v4172_v52 }
 0x32e   : > { %2029 = vmatmul.msk.f32.gmra.mxu3 %vm1507_vm11, %v1499_v53 }
 0x330   : > { %v4181_v19 = vpop.f32.mrf.mxu3 }
 0x331   : > { %1745 = vst [vmem:[%s4064_s6 + $0xc0] sm:$0xff] %v4181_v19 }
 0x333   : > { %v1661_v35 = vpop.f32.mrf.mxu1  ;;  %v1013_v29 = vpop.permute.xlu1 %1012 }
 0x334   : > { %1733 = vst [vmem:[%s4064_s6 + $0x60] sm:$0xff] %v1661_v35  ;;  %v1203_v26 = vpop.permute.xlu0 %1202  ;;  %v1435_v3 = vsel %vm1403_vm8, %v3733_v59, %v1013_v29  ;;  %v1802_v47 = vmul.f32 %v1661_v35, %v1661_v35 }
 0x335   : > { %v1500_v60 = vsel %vm1469_vm10, %v1467_v7, %v1203_v26  ;;  %v1468_v62 = vsel %vm1436_vm9, %v1435_v3, %v1109_v31 }
 0x336   : > { %2030 = vmatmul.msk.f32.gmra.mxu3 %vm1507_vm11, %v1500_v60 }
 0x33a   : > { %v1643_v18 = vpop.f32.mrf.mxu0 }
 0x33b   : > { %1727 = vst [vmem:[%s4064_s6 + $0x30] sm:$0xff] %v1643_v18  ;;  %v1758_v22 = vadd.f32 %v1757_v44, %v1643_v18  ;;  %v1796_v6 = vmul.f32 %v1643_v18, %v1643_v18 }
 0x33c   : > { %v1205_v11 = vpop.permute.xlu0 %1204 }
 0x33d   : > { %v1827_v58 = vadd.f32 %v1826_v4, %v1796_v6  ;;  %v1501_v40 = vsel %vm1469_vm10, %v1468_v62, %v1205_v11 }
 0x33e   : > { %2031 = vmatmul.msk.f32.gmra.mxu3 %vm1507_vm11, %v1501_v40 }
 0x349   : > { %v1682_v12 = vpop.f32.mrf.mxu2 }
 0x34a   : > { %1740 = vst [vmem:[%s4064_s6 + $0x98] sm:$0xff] %v1682_v12  ;;  %v1809_v32 = vmul.f32 %v1682_v12, %v1682_v12 }
 0x350   : > { %v4198_v48 = vpop.f32.mrf.mxu3 }
 0x351   : > { %1746 = vst [vmem:[%s4064_s6 + $0xc8] sm:$0xff] %v4198_v48 }
 0x353   : > { %v1664_v59 = vpop.f32.mrf.mxu1 }
 0x354   : > { %1734 = vst [vmem:[%s4064_s6 + $0x68] sm:$0xff] %v1664_v59  ;;  %v1803_v27 = vmul.f32 %v1664_v59, %v1664_v59 }
 0x35a   : > { %v1646_v24 = vpop.f32.mrf.mxu0 }
 0x35b   : > { %1728 = vst [vmem:[%s4064_s6 + $0x38] sm:$0xff] %v1646_v24  ;;  %v1759_v13 = vadd.f32 %v1758_v22, %v1646_v24  ;;  %v1797_v49 = vmul.f32 %v1646_v24, %v1646_v24 }
 0x35d   : > { %v1760_v33 = vadd.f32 %v1759_v13, %v4097_v51  ;;  %v1828_v42 = vadd.f32 %v1827_v58, %v1797_v49  ;;  %v1815_v13 = vmul.f32 %v4198_v48, %v4198_v48 }
 0x35f   : > { %v1761_v37 = vadd.f32 %v1760_v33, %v4109_v23  ;;  %v1829_v41 = vadd.f32 %v1828_v42, %v1798_v15 }
 0x361   : > { %v1762_v25 = vadd.f32 %v1761_v37, %v4133_v20  ;;  %v1830_v10 = vadd.f32 %v1829_v41, %v1799_v45 }
 0x363   : > { %v1831_v51 = vadd.f32 %v1830_v10, %v1800_v54  ;;  %v1763_v63 = vadd.f32 %v1762_v25, %v4152_v8 }
 0x365   : > { %v1764_v5 = vadd.f32 %v1763_v63, %v1661_v35  ;;  %v1832_v23 = vadd.f32 %v1831_v51, %v1801_v50 }
 0x367   : > { %v1765_v28 = vadd.f32 %v1764_v5, %v1664_v59  ;;  %v1833_v30 = vadd.f32 %v1832_v23, %v1802_v47 }
 0x369   : > { %v1834_v44 = vadd.f32 %v1833_v30, %v1803_v27 }
 0x36a   : > { %v1685_v39 = vpop.f32.mrf.mxu2 }
 0x36b   : > { %1741 = vst [vmem:[%s4064_s6 + $0xa0] sm:$0xff] %v1685_v39  ;;  %v1810_v7 = vmul.f32 %v1685_v39, %v1685_v39 }
 0x36c   : > { %v1667_v20 = vpop.f32.mrf.mxu1 }
 0x36d   : > { %1735 = vst [vmem:[%s4064_s6 + $0x70] sm:$0xff] %v1667_v20  ;;  %v1804_v34 = vmul.f32 %v1667_v20, %v1667_v20  ;;  %v1766_v4 = vadd.f32 %v1765_v28, %v1667_v20 }
 0x36f   : > { %v1835_v43 = vadd.f32 %v1834_v44, %v1804_v34 }
 0x371   : > { %v1703_v57 = vpop.f32.mrf.mxu3 }
 0x372   : > { %1747 = vst [vmem:[%s4064_s6 + $0xd0] sm:$0xff] %v1703_v57  ;;  %v1816_v33 = vmul.f32 %v1703_v57, %v1703_v57 }
 0x382   : > { %v1688_v36 = vpop.f32.mrf.mxu2 }
 0x383   : > { %1742 = vst [vmem:[%s4064_s6 + $0xa8] sm:$0xff] %v1688_v36  ;;  %v1811_v31 = vmul.f32 %v1688_v36, %v1688_v36 }
 0x384   : > { %v1670_v8 = vpop.f32.mrf.mxu1 }
 0x385   : > { %1736 = vst [vmem:[%s4064_s6 + $0x78] sm:$0xff] %v1670_v8  ;;  %v1767_v56 = vadd.f32 %v1766_v4, %v1670_v8  ;;  %v1805_v38 = vmul.f32 %v1670_v8, %v1670_v8 }
 0x387   : > { %v1768_v55 = vadd.f32 %v1767_v56, %v4124_v1  ;;  %v1836_v21 = vadd.f32 %v1835_v43, %v1805_v38 }
 0x389   : > { %v1769_v9 = vadd.f32 %v1768_v55, %v4148_v2  ;;  %v1837_v61 = vadd.f32 %v1836_v21, %v1806_v0  ;;  %v1706_v16 = vpop.f32.mrf.mxu3 }
 0x38a   : > { %1748 = vst [vmem:[%s4064_s6 + $0xd8] sm:$0xff] %v1706_v16  ;;  %v1817_v54 = vmul.f32 %v1706_v16, %v1706_v16 }
 0x38b   : > { %v1770_v53 = vadd.f32 %v1769_v9, %v4172_v52  ;;  %v1838_v46 = vadd.f32 %v1837_v61, %v1807_v17 }
 0x38d   : > { %v1839_v35 = vadd.f32 %v1838_v46, %v1808_v14  ;;  %v1771_v1 = vadd.f32 %v1770_v53, %v1682_v12  ;;  %v1814_v12 = vmul.f32 %v4181_v19, %v4181_v19 }
 0x38f   : > { %v1772_v26 = vadd.f32 %v1771_v1, %v1685_v39  ;;  %v1840_v60 = vadd.f32 %v1839_v35, %v1809_v32 }
 0x391   : > { %v1841_v29 = vadd.f32 %v1840_v60, %v1810_v7  ;;  %v1773_v18 = vadd.f32 %v1772_v26, %v1688_v36 }
 0x393   : > { %v1842_v62 = vadd.f32 %v1841_v29, %v1811_v31 }
 0x39a   : > { %v1691_v3 = vpop.f32.mrf.mxu2 }
 0x39b   : > { %1743 = vst [vmem:[%s4064_s6 + $0xb0] sm:$0xff] %v1691_v3  ;;  %v1812_v22 = vmul.f32 %v1691_v3, %v1691_v3  ;;  %v1774_v6 = vadd.f32 %v1773_v18, %v1691_v3 }
 0x39d   : > { %v1843_v11 = vadd.f32 %v1842_v62, %v1812_v22 }
 0x3a1   : > { %v1709_v2 = vpop.f32.mrf.mxu3 }
 0x3a2   : > { %1749 = vst [vmem:[%s4064_s6 + $0xe0] sm:$0xff] %v1709_v2 }
 0x3aa   : > { %v1694_v52 = vpop.f32.mrf.mxu2 }
 0x3ab   : > { %1744 = vst [vmem:[%s4064_s6 + $0xb8] sm:$0xff] %v1694_v52  ;;  %v1775_v58 = vadd.f32 %v1774_v6, %v1694_v52  ;;  %v1813_v40 = vmul.f32 %v1694_v52, %v1694_v52 }
 0x3ad   : > { %v1776_v59 = vadd.f32 %v1775_v58, %v4181_v19  ;;  %v1844_v24 = vadd.f32 %v1843_v11, %v1813_v40  ;;  %v1818_v19 = vmul.f32 %v1709_v2, %v1709_v2 }
 0x3af   : > { %v1777_v49 = vadd.f32 %v1776_v59, %v4198_v48  ;;  %v1845_v15 = vadd.f32 %v1844_v24, %v1814_v12 }
 0x3b1   : > { %v1778_v42 = vadd.f32 %v1777_v49, %v1703_v57  ;;  %v1846_v45 = vadd.f32 %v1845_v15, %v1815_v13  ;;  %v1712_v37 = vpop.f32.mrf.mxu3 }
 0x3b2   : > { %1750 = vst [vmem:[%s4064_s6 + $0xe8] sm:$0xff] %v1712_v37  ;;  %v1819_v47 = vmul.f32 %v1712_v37, %v1712_v37 }
 0x3b3   : > { %v1847_v41 = vadd.f32 %v1846_v45, %v1816_v33  ;;  %v1779_v25 = vadd.f32 %v1778_v42, %v1706_v16 }
 0x3b5   : > { %v1848_v10 = vadd.f32 %v1847_v41, %v1817_v54  ;;  %v1780_v50 = vadd.f32 %v1779_v25, %v1709_v2 }
 0x3b7   : > { %v1849_v63 = vadd.f32 %v1848_v10, %v1818_v19  ;;  %v1781_v48 = vadd.f32 %v1780_v50, %v1712_v37 }
 0x3b9   : > { %v1715_v51 = vpop.f32.mrf.mxu3  ;;  %v1850_v5 = vadd.f32 %v1849_v63, %v1819_v47 }
 0x3ba   : > { %1751 = vst [vmem:[%s4064_s6 + $0xf0] sm:$0xff] %v1715_v51  ;;  %v1820_v23 = vmul.f32 %v1715_v51, %v1715_v51  ;;  %v1782_v27 = vadd.f32 %v1781_v48, %v1715_v51 }
 0x3bc   : > { %v1851_v30 = vadd.f32 %v1850_v5, %v1820_v23 }
 0x3c1   : > { %v1718_v28 = vpop.f32.mrf.mxu3 }
 0x3c2   : > { %1752 = vst [vmem:[%s4064_s6 + $0xf8] sm:$0xff] %v1718_v28  ;;  %v1783_v44 = vadd.f32 %v1782_v27, %v1718_v28  ;;  %v1821_v39 = vmul.f32 %v1718_v28, %v1718_v28 }
 0x3c3   : > { %2169 = shalt.err (!%p2166_p3)
}
 0x3c4   : > { %s2246_s5 = smov 128   ;;  %v1784_v20 = vrot.slane %v1783_v44, 4  ;;  %v1852_v57 = vadd.f32 %v1851_v30, %v1821_v39  ;;  %s1997_s6 = sshll.u32 %s4050_s4, 1  ;;  %vm1859_vm12 = vcmask 1040384  }
 0x3c5   : > { %2056 = dma.vmem_to_hbm [thread:$0]  (%p2305_p5), %s1881_s10, 4096, %s1883_s11, %s1863_s17, %s2246_s5, %s2246_s5, %s2239_s30  }
 0x3c6   : > { %v1785_v34 = vadd.f32 %v1784_v20, %v1783_v44  ;;  %v1853_v36 = vrot.slane %v1852_v57, 4  ;;  %s2036_s28 = sshll.u32 %s2288_s16, 1  ;;  %s174_s30 = scalar_lea.vmem [#allocation4], %s1997_s6 }
 0x3c7   : > { %s1895_s9 = scalar_lea.hbm %s4296_s3, %s2036_s28  ;;  %s1897_s10 = sshll.u32 %s174_s30, 4  ;;  %s1898_s10 = int_to_ptr.vmem [resolvable:$true] %s1897_s10 }
 0x3c8   : > { %v1786_v4 = vrot.slane %v1785_v34, 2  ;;  %v1854_v8 = vadd.f32 %v1853_v36, %v1852_v57  ;;  %s1899_s11 = sshll.u32 %s1895_s9, 4  ;;  %s1868_s16 = scalar_lea.sflag [#allocation5], %s4050_s4  ;;  %s1900_s11 = int_to_ptr.hbm [resolvable:$true] %s1899_s11 }
 0x3c9   : > { %s2184_s17 = sshra.s32 %s1900_s11, 4  ;;  %s2190_s25 = scalar_lea.hbm %s4296_s3, 4  ;;  %s2185_s17 = int_to_ptr.hbm [resolvable:$true] %s2184_s17 }
 0x3ca   : > { %v1787_v43 = vadd.f32 %v1786_v4, %v1785_v34  ;;  %v1855_v56 = vrot.slane %v1854_v8, 2  ;;  %s2186_s19 = scalar_lea.hbm %s2185_s17, 2  ;;  %p2191_p9 = scmp.lt.s32.totalorder %s2185_s17, %s4296_s3 }
 0x3cb   : > { %p2187_p4 = scmp.ne.s32.totalorder %s2185_s17, %s2186_s19  ;;  %p2192_p10 = scmp.lt.s32.totalorder %s2190_s25, %s2186_s19 }
 0x3cc   : > { %v1788_v38 = vrot.slane %v1787_v43, 1  ;;  %v1856_v0 = vadd.f32 %v1855_v56, %v1854_v8 }
 0x3cd   : > { %p2188_p7 = pnand %p2187_p4, %p2305_p5  ;;  %p2193_p11 = por %p2192_p10, %p2191_p9 }
 0x3ce   : > { %v1857_v55 = vrot.slane %v1856_v0, 1  ;;  %v1789_v21 = vadd.f32 %v1788_v38, %v1787_v43 }
 0x3cf   : > { %p2189_p8 = pneg %p2188_p7 }
 0x3d0   : > { %v1858_v17 = vadd.f32 %v1857_v55, %v1856_v0 }
 0x3d1   : > { %p2194_p12 = pnand %p2193_p11, %p2189_p8 }
 0x3d2   : > { %v1860_v9 = vsel %vm1859_vm12, %v1789_v21, %v1858_v17 }
 0x3d3   : > { %1861 = vst [vmem:[%s174_s30] sm:$0x3] %v1860_v9 }
 0x3d4   : > { %2197 = shalt.err (!%p2194_p12)
}
 0x3d5   : > { %2057 = dma.vmem_to_hbm [thread:$0]  (%p2305_p5), %s1898_s10, 32, %s1900_s11, %s1868_s16  }
 0x3d6 PF: > { %p2067_p13 = scmp.ge.s32.totalorder %s2236_s15, 2  ;;  %s1911_s4 = sand.u32 1, %s2224_s12  }
 0x3d7   : > { %s1912_s29 = scalar_lea.sflag [#allocation3], %s1911_s4 }
 0x3d8   : > { %p2061_p0 = pnand %p2067_p13, %p2309_p6 }
 0x3da   : > { %p2062_p1 = pneg %p2061_p0 }
 0x3dc   : > { %2215 = dma.done.wait (%p2062_p1), %s1912_s29, 4096  }
 0x3dd   : > { %2217 = vsyncadd (%p2062_p1), %s1912_s29, 4294963200  ;;  %s1922_s5 = scalar_lea.sflag [#allocation5], %s1911_s4 }
 0x3de   : > { %2219 = dma.done.wait (%p2062_p1), %s1922_s5, 32  }
 0x3df   : > { %2221 = vsyncadd (%p2062_p1), %s1922_s5, 4294967264  ;;  %p17_p5 = scmp.ge.s32.totalorder %s2292_s18, 4   ;;  %s4703_s12 = smov %s2228_s13 }
 0x3e0   : > { %s4704_s13 = smov %s2232_s14  ;;  %s4705_s14 = smov %s2303_s21 }
 0x3e1   : > { %s4706_s15 = smov %s2292_s18  ;;  %19 = sbr.rel (!%p17_p5) target bundleno = 5 (0x5), region = 80 }
 0x3e6   :  { %1928 = vsyncpa [#allocation3], 1 }
 0x3e7   :  { %1930 = vsyncpa [#allocation3 + $0x1], 1 }
 0x3e8   :  { %1931 = vsyncpa [#allocation5], 1 }
 0x3e9   :  { %1933 = vsyncpa [#allocation5 + $0x1], 1 }

</bundles_post_ra>
